<compile_context>
chip_gen: v6e
topology: v6e:2x2x1
jax: 0.10.0
libtpu: 0.0.40
codegen_flags: <defaults>
</compile_context>

<pallas_src>
import functools

import jax
import jax.numpy as jnp
from jax.experimental import pallas as pl
from jax.experimental.pallas import tpu as pltpu

BN_EPS = 1e-5
_VMEM_LIMIT = 48 * 1024 * 1024  # above v5e/v6e scoped defaults, below v7x 64MiB


# --------------------------- kernels ---------------------------------------
def conv_stats_kernel(*refs, pre_bn):
    """3x3 'same' conv of one image (+ optional preceding folded-BN + ReLU),
    plus per-image per-channel (sum, sum_sq) of the conv output.

    refs = (x, w, [scale, bias,] out, stats, xp_scratch)
      x      : (1, H, W, Cin)    activation (mxu dtype)
      w      : (3, 3*Cin, Cout)  per-kh weight matrices (kw-major, cin-minor)
      scale  : (1, Cin) f32      folded BN scale   (only if pre_bn)
      bias   : (1, Cin) f32      folded BN bias    (only if pre_bn)
      out    : (1, H, W, Cout)   conv output (mxu dtype)
      stats  : (1, 2, Cout) f32  [sum, sum_sq] over this image
      xp     : (H+2, W+2, Cin)   persistent padded VMEM scratch
    """
    if pre_bn:
        x_ref, w_ref, scale_ref, bias_ref, out_ref, stats_ref, xp_ref = refs
    else:
        x_ref, w_ref, out_ref, stats_ref, xp_ref = refs

    Hp2, Wp2, Cin = xp_ref.shape
    H, W = Hp2 - 2, Wp2 - 2
    Cout = out_ref.shape[-1]
    M = H * W

    x = x_ref[0]                                        # (H, W, Cin)
    if pre_bn:
        # h = relu(BN(prev_conv)) with BN folded to per-channel scale/bias.
        scale = scale_ref[...].reshape(1, 1, Cin)
        bias = bias_ref[...].reshape(1, 1, Cin)
        x = jnp.maximum(x.astype(jnp.float32) * scale + bias, 0.0)
        x = x.astype(xp_ref.dtype)

    # Persistent padded scratch: zero only the 1-px border, overwrite interior.
    zrow = jnp.zeros((1, Wp2, Cin), xp_ref.dtype)
    xp_ref[0:1, :, :] = zrow
    xp_ref[H + 1:H + 2, :, :] = zrow
    zcol = jnp.zeros((H, 1, Cin), xp_ref.dtype)
    xp_ref[1:H + 1, 0:1, :] = zcol
    xp_ref[1:H + 1, W + 1:W + 2, :] = zcol
    xp_ref[1:H + 1, 1:W + 1, :] = x

    # 3x3 conv = 3 MXU matmuls (one per kernel row kh); contraction K = 3*Cin
    # (the three kw taps concatenated along channels); f32 accumulation.
    acc = jnp.zeros((M, Cout), jnp.float32)
    for kh in range(3):
        rows = xp_ref[kh:kh + H, :, :]                  # (H, W+2, Cin)
        grp = jnp.concatenate(
            [rows[:, 0:W, :], rows[:, 1:W + 1, :], rows[:, 2:W + 2, :]],
            axis=-1)                                    # (H, W, 3*Cin)
        acc = acc + jnp.dot(grp.reshape(M, 3 * Cin), w_ref[kh],
                            preferred_element_type=jnp.float32)

    out_ref[0] = acc.reshape(H, W, Cout).astype(out_ref.dtype)
    s = jnp.sum(acc, axis=0, keepdims=True)             # (1, Cout)
    ss = jnp.sum(acc * acc, axis=0, keepdims=True)      # (1, Cout)
    stats_ref[0] = jnp.concatenate([s, ss], axis=0)     # (2, Cout)


def finalize_kernel(a2_ref, scale_ref, bias_ref, x_ref, out_ref):
    """y = relu(BN2(a2) + shortcut), BN2 folded to scale/bias."""
    C = out_ref.shape[-1]
    scale = scale_ref[...].reshape(1, 1, C)
    bias = bias_ref[...].reshape(1, 1, C)
    y = a2_ref[0].astype(jnp.float32) * scale + bias \
        + x_ref[0].astype(jnp.float32)
    out_ref[0] = jnp.maximum(y, 0.0).astype(out_ref.dtype)


# --------------------------- pallas_call wrappers ---------------------------
def _conv_bn_stats(x, w_r, scale=None, bias=None, *, act_dtype):
    """Gridded (over N) conv3x3 pass; optional preceding folded-BN + ReLU.

    Returns (conv output in act_dtype, per-image (2, Cout) f32 stats)."""
    N, H, W, Cin = x.shape
    Cout = w_r.shape[-1]
    pre_bn = scale is not None

    in_specs = [
        pl.BlockSpec((1, H, W, Cin), lambda n: (n, 0, 0, 0)),
        pl.BlockSpec((3, 3 * Cin, Cout), lambda n: (0, 0, 0)),
    ]
    operands = [x, w_r]
    if pre_bn:
        in_specs += [pl.BlockSpec((1, Cin), lambda n: (0, 0)),
                     pl.BlockSpec((1, Cin), lambda n: (0, 0))]
        operands += [scale, bias]

    return pl.pallas_call(
        functools.partial(conv_stats_kernel, pre_bn=pre_bn),
        grid=(N,),
        in_specs=in_specs,
        out_specs=(pl.BlockSpec((1, H, W, Cout), lambda n: (n, 0, 0, 0)),
                   pl.BlockSpec((1, 2, Cout), lambda n: (n, 0, 0))),
        out_shape=(jax.ShapeDtypeStruct((N, H, W, Cout), act_dtype),
                   jax.ShapeDtypeStruct((N, 2, Cout), jnp.float32)),
        scratch_shapes=[pltpu.VMEM((H + 2, W + 2, Cin), act_dtype)],
        compiler_params=pltpu.CompilerParams(
            dimension_semantics=("parallel",),
            vmem_limit_bytes=_VMEM_LIMIT),
    )(*operands)


def _bn_residual_relu(a2, scale, bias, shortcut):
    N, H, W, C = a2.shape
    return pl.pallas_call(
        finalize_kernel,
        grid=(N,),
        in_specs=[pl.BlockSpec((1, H, W, C), lambda n: (n, 0, 0, 0)),
                  pl.BlockSpec((1, C), lambda n: (0, 0)),
                  pl.BlockSpec((1, C), lambda n: (0, 0)),
                  pl.BlockSpec((1, H, W, C), lambda n: (n, 0, 0, 0))],
        out_specs=pl.BlockSpec((1, H, W, C), lambda n: (n, 0, 0, 0)),
        out_shape=jax.ShapeDtypeStruct((N, H, W, C), jnp.float32),
        compiler_params=pltpu.CompilerParams(
            dimension_semantics=("parallel",),
            vmem_limit_bytes=_VMEM_LIMIT),
    )(a2, scale, bias, shortcut)


def _fold_bn(stats, gamma, beta, count):
    """Reduce per-image (sum, sum_sq) to global batch statistics and fold
    gamma/beta:  y = x * scale + bias  ==  BN(x) (training mode, biased var)."""
    s = jnp.sum(stats[:, 0, :], axis=0)
    ss = jnp.sum(stats[:, 1, :], axis=0)
    mean = s / count
    var = jnp.maximum(ss / count - mean * mean, 0.0)   # guard cancellation
    scale = gamma.reshape(-1) * jax.lax.rsqrt(var + BN_EPS)
    bias = beta.reshape(-1) - mean * scale
    return (scale.reshape(1, -1).astype(jnp.float32),
            bias.reshape(1, -1).astype(jnp.float32))


def basic_block_forward(x_nhwc, w1, g1, b1, w2, g2, b2,
                        mxu_dtype=jnp.bfloat16):
    """x_nhwc: (N, H, W, C) f32; w1/w2: HWIO (3, 3, Cin, Cout); g*/b*: (1, Cout)
    f32.  Returns (N, H, W, Cout2) f32.  Training-mode BatchNorm with exact
    global batch statistics (preserved under the batch-axis grid)."""
    N, H, W, C = x_nhwc.shape
    C1, C2 = w1.shape[-1], w2.shape[-1]
    assert C2 == C, "BasicBlock residual requires inplanes == planes"
    count = float(N * H * W)

    # Cast activations once in the wrapper (halves HBM traffic on the bf16
    # path); weights in per-kh im2col-row layout (kw-major, cin-minor).
    x_lp = x_nhwc.astype(mxu_dtype)
    w1r = w1.reshape(3, 3 * C, C1).astype(mxu_dtype)
    w2r = w2.reshape(3, 3 * C1, C2).astype(mxu_dtype)

    # Pass 1: a1 = conv1(x), per-image channel stats.
    a1, st1 = _conv_bn_stats(x_lp, w1r, act_dtype=mxu_dtype)
    scale1, bias1 = _fold_bn(st1, g1, b1, count)

    # Pass 2: h = relu(BN1(a1)) (folded), a2 = conv2(h), per-image stats.
    a2, st2 = _conv_bn_stats(a1, w2r, scale1, bias1, act_dtype=mxu_dtype)
    scale2, bias2 = _fold_bn(st2, g2, b2, count)

    # Pass 3: y = relu(BN2(a2) + x).
    return _bn_residual_relu(a2, scale2, bias2, x_lp)


# ----------------------- pure-JAX reference (for sanity) --------------------
def _ref_conv3x3(x, w):
    return jax.lax.conv_general_dilated(
        x, w, window_strides=(1, 1), padding=((1, 1), (1, 1)),
        dimension_numbers=("NHWC", "HWIO", "NHWC"))


def _ref_bn(x, gamma, beta):
    mean = jnp.mean(x, axis=(0, 1, 2), keepdims=True)
    var = jnp.mean((x - mean) ** 2, axis=(0, 1, 2), keepdims=True)
    return (x - mean) * jax.lax.rsqrt(var + BN_EPS) * gamma + beta


def basic_block_ref(x, w1, g1, b1, w2, g2, b2):
    h = jnp.maximum(_ref_bn(_ref_conv3x3(x, w1), g1, b1), 0.0)
    y = _ref_bn(_ref_conv3x3(h, w2), g2, b2) + x
    return jnp.maximum(y, 0.0)


if __name__ == "__main__":
    # Small shapes consistent with BasicBlock(inplanes=8, planes=8, stride=1).
    N, C, Hs, Ws = 2, 8, 16, 16
    key = jax.random.PRNGKey(0)
    kx, kw1, kw2 = jax.random.split(key, 3)

    # PyTorch-convention NCHW input, converted to kernel layout NHWC.
    x_nchw = jax.random.normal(kx, (N, C, Hs, Ws), dtype=jnp.float32)
    x_nhwc = jnp.transpose(x_nchw, (0, 2, 3, 1))

    # conv1.weight / conv2.weight: PyTorch shape (Cout, Cin, 3, 3) -> HWIO.
    fan_in = C * 3 * 3
    std = (2.0 / fan_in) ** 0.5
    w1 = (std * jax.random.normal(kw1, (C, C, 3, 3), jnp.float32)
          ).transpose(2, 3, 1, 0)  # HWIO
    w2 = (std * jax.random.normal(kw2, (C, C, 3, 3), jnp.float32)
          ).transpose(2, 3, 1, 0)  # HWIO

    # Freshly-initialized BatchNorm affine params: gamma=1, beta=0.
    g1 = jnp.ones((1, C), jnp.float32)
    b1 = jnp.zeros((1, C), jnp.float32)
    g2 = jnp.ones((1, C), jnp.float32)
    b2 = jnp.zeros((1, C), jnp.float32)

    ref = basic_block_ref(x_nhwc, w1, g1.reshape(1, 1, 1, C),
                          b1.reshape(1, 1, 1, C), w2,
                          g2.reshape(1, 1, 1, C), b2.reshape(1, 1, 1, C))

    # f32 path: exact conv/BN semantics, tight tolerance.
    out_f32 = jax.block_until_ready(
        basic_block_forward(x_nhwc, w1, g1, b1, w2, g2, b2,
                            mxu_dtype=jnp.float32))
    assert out_f32.shape == (N, Hs, Ws, C)
    assert jnp.allclose(out_f32, ref, rtol=1e-4, atol=1e-4), \
        float(jnp.max(jnp.abs(out_f32 - ref)))

    # Default bf16 path (f32 accumulation / f32 BN math); BN renormalizes, so
    # looser tolerance against the f32 reference is expected and acceptable.
    out = jax.block_until_ready(
        basic_block_forward(x_nhwc, w1, g1, b1, w2, g2, b2))
    assert out.shape == (N, Hs, Ws, C)
    assert jnp.allclose(out, ref, rtol=1e-1, atol=1e-1), \
        float(jnp.max(jnp.abs(out - ref)))

    print("KERNEL_OK")
</pallas_src>

<mosaic_0001>
module attributes {stable_mosaic.version = 11 : i64} {
  func.func @conv_stats_kernel(%arg0: i32, %arg1: memref<1x16x16x8xf32, #tpu.memory_space<vmem>>, %arg2: memref<3x24x8xf32, #tpu.memory_space<vmem>>, %arg3: memref<1x16x16x8xf32, #tpu.memory_space<vmem>>, %arg4: memref<1x2x8xf32, #tpu.memory_space<vmem>>, %arg5: memref<18x18x8xf32, #tpu.memory_space<vmem>>) attributes {dimension_semantics = [#tpu.dimension_semantics<parallel>], iteration_bounds = array<i64: 2>, scalar_prefetch = 0 : i64, scratch_operands = 1 : i64, tpu.core_type = #tpu.core_type<tc>, window_params = [{transform_indices = @transform_0, window_bounds = array<i64: 1, 16, 16, 8>}, {pipeline_mode = #tpu.pipeline_mode<synchronous>, transform_indices = @transform_1, window_bounds = array<i64: 3, 24, 8>}, {transform_indices = @transform_2, window_bounds = array<i64: 1, 16, 16, 8>}, {transform_indices = @transform_3, window_bounds = array<i64: 1, 2, 8>}]} {
    %c0 = arith.constant 0 : index
    %c0_0 = arith.constant 0 : index
    %c0_1 = arith.constant 0 : index
    %c0_2 = arith.constant 0 : index
    %0 = vector.load %arg1[%c0, %c0_0, %c0_1, %c0_2] : memref<1x16x16x8xf32, #tpu.memory_space<vmem>>, vector<1x16x16x8xf32>
    %1 = vector.shape_cast %0 : vector<1x16x16x8xf32> to vector<16x16x8xf32>
    %cst = arith.constant 0.000000e+00 : f32
    %2 = vector.broadcast %cst : f32 to vector<1x18x8xf32>
    %c0_3 = arith.constant 0 : index
    %c0_4 = arith.constant 0 : index
    %c0_5 = arith.constant 0 : index
    %3 = vector.load %arg5[%c0_3, %c0_4, %c0_5] : memref<18x18x8xf32, #tpu.memory_space<vmem>>, vector<1x18x8xf32>
    tpu.vector_store %arg5[%c0_3, %c0_4, %c0_5], %2 {strides = array<i32>} : memref<18x18x8xf32, #tpu.memory_space<vmem>>, vector<1x18x8xf32>,
    %c17 = arith.constant 17 : index
    %c0_6 = arith.constant 0 : index
    %c0_7 = arith.constant 0 : index
    %4 = vector.load %arg5[%c17, %c0_6, %c0_7] : memref<18x18x8xf32, #tpu.memory_space<vmem>>, vector<1x18x8xf32>
    tpu.vector_store %arg5[%c17, %c0_6, %c0_7], %2 {strides = array<i32>} : memref<18x18x8xf32, #tpu.memory_space<vmem>>, vector<1x18x8xf32>,
    %cst_8 = arith.constant 0.000000e+00 : f32
    %5 = vector.broadcast %cst_8 : f32 to vector<16x1x8xf32>
    %c1 = arith.constant 1 : index
    %c0_9 = arith.constant 0 : index
    %c0_10 = arith.constant 0 : index
    %6 = vector.load %arg5[%c1, %c0_9, %c0_10] : memref<18x18x8xf32, #tpu.memory_space<vmem>>, vector<16x1x8xf32>
    tpu.vector_store %arg5[%c1, %c0_9, %c0_10], %5 {strides = array<i32>} : memref<18x18x8xf32, #tpu.memory_space<vmem>>, vector<16x1x8xf32>,
    %c1_11 = arith.constant 1 : index
    %c17_12 = arith.constant 17 : index
    %c0_13 = arith.constant 0 : index
    %7 = vector.load %arg5[%c1_11, %c17_12, %c0_13] : memref<18x18x8xf32, #tpu.memory_space<vmem>>, vector<16x1x8xf32>
    tpu.vector_store %arg5[%c1_11, %c17_12, %c0_13], %5 {strides = array<i32>} : memref<18x18x8xf32, #tpu.memory_space<vmem>>, vector<16x1x8xf32>,
    %c1_14 = arith.constant 1 : index
    %c1_15 = arith.constant 1 : index
    %c0_16 = arith.constant 0 : index
    %8 = vector.load %arg5[%c1_14, %c1_15, %c0_16] : memref<18x18x8xf32, #tpu.memory_space<vmem>>, vector<16x16x8xf32>
    tpu.vector_store %arg5[%c1_14, %c1_15, %c0_16], %1 {strides = array<i32>} : memref<18x18x8xf32, #tpu.memory_space<vmem>>, vector<16x16x8xf32>,
    %cst_17 = arith.constant 0.000000e+00 : f32
    %9 = vector.broadcast %cst_17 : f32 to vector<256x8xf32>
    %c0_18 = arith.constant 0 : index
    %c0_19 = arith.constant 0 : index
    %c0_20 = arith.constant 0 : index
    %10 = vector.load %arg5[%c0_18, %c0_19, %c0_20] : memref<18x18x8xf32, #tpu.memory_space<vmem>>, vector<16x18x8xf32>
    %11 = vector.extract_strided_slice %10 {offsets = [0, 0, 0], sizes = [16, 16, 8], strides = [1, 1, 1]} : vector<16x18x8xf32> to vector<16x16x8xf32>
    %12 = vector.extract_strided_slice %10 {offsets = [0, 1, 0], sizes = [16, 16, 8], strides = [1, 1, 1]} : vector<16x18x8xf32> to vector<16x16x8xf32>
    %13 = vector.extract_strided_slice %10 {offsets = [0, 2, 0], sizes = [16, 16, 8], strides = [1, 1, 1]} : vector<16x18x8xf32> to vector<16x16x8xf32>
    %14 = tpu.concatenate %11, %12, %13 in 2 : vector<16x16x8xf32>, vector<16x16x8xf32>, vector<16x16x8xf32> -> vector<16x16x24xf32>
    %15 = vector.shape_cast %14 : vector<16x16x24xf32> to vector<256x24xf32>
    %c0_21 = arith.constant 0 : index
    %c0_22 = arith.constant 0 : index
    %c0_23 = arith.constant 0 : index
    %16 = vector.load %arg2[%c0_21, %c0_22, %c0_23] : memref<3x24x8xf32, #tpu.memory_space<vmem>>, vector<1x24x8xf32>
    %17 = vector.shape_cast %16 : vector<1x24x8xf32> to vector<24x8xf32>
    %cst_24 = arith.constant dense<0.000000e+00> : vector<256x8xf32>
    %18 = tpu.matmul %15, %17, %cst_24 {dimension_numbers = #tpu.dot_dimension_numbers<[1], [0], [0], [1], [0, 0, 1, 1], [], []>} : vector<256x24xf32>, vector<24x8xf32>, vector<256x8xf32> -> vector<256x8xf32>
    %19 = arith.addf %9, %18 : vector<256x8xf32>
    %c1_25 = arith.constant 1 : index
    %c0_26 = arith.constant 0 : index
    %c0_27 = arith.constant 0 : index
    %20 = vector.load %arg5[%c1_25, %c0_26, %c0_27] : memref<18x18x8xf32, #tpu.memory_space<vmem>>, vector<16x18x8xf32>
    %21 = vector.extract_strided_slice %20 {offsets = [0, 0, 0], sizes = [16, 16, 8], strides = [1, 1, 1]} : vector<16x18x8xf32> to vector<16x16x8xf32>
    %22 = vector.extract_strided_slice %20 {offsets = [0, 1, 0], sizes = [16, 16, 8], strides = [1, 1, 1]} : vector<16x18x8xf32> to vector<16x16x8xf32>
    %23 = vector.extract_strided_slice %20 {offsets = [0, 2, 0], sizes = [16, 16, 8], strides = [1, 1, 1]} : vector<16x18x8xf32> to vector<16x16x8xf32>
    %24 = tpu.concatenate %21, %22, %23 in 2 : vector<16x16x8xf32>, vector<16x16x8xf32>, vector<16x16x8xf32> -> vector<16x16x24xf32>
    %25 = vector.shape_cast %24 : vector<16x16x24xf32> to vector<256x24xf32>
    %c1_28 = arith.constant 1 : index
    %c0_29 = arith.constant 0 : index
    %c0_30 = arith.constant 0 : index
    %26 = vector.load %arg2[%c1_28, %c0_29, %c0_30] : memref<3x24x8xf32, #tpu.memory_space<vmem>>, vector<1x24x8xf32>
    %27 = vector.shape_cast %26 : vector<1x24x8xf32> to vector<24x8xf32>
    %cst_31 = arith.constant dense<0.000000e+00> : vector<256x8xf32>
    %28 = tpu.matmul %25, %27, %cst_31 {dimension_numbers = #tpu.dot_dimension_numbers<[1], [0], [0], [1], [0, 0, 1, 1], [], []>} : vector<256x24xf32>, vector<24x8xf32>, vector<256x8xf32> -> vector<256x8xf32>
    %29 = arith.addf %19, %28 : vector<256x8xf32>
    %c2 = arith.constant 2 : index
    %c0_32 = arith.constant 0 : index
    %c0_33 = arith.constant 0 : index
    %30 = vector.load %arg5[%c2, %c0_32, %c0_33] : memref<18x18x8xf32, #tpu.memory_space<vmem>>, vector<16x18x8xf32>
    %31 = vector.extract_strided_slice %30 {offsets = [0, 0, 0], sizes = [16, 16, 8], strides = [1, 1, 1]} : vector<16x18x8xf32> to vector<16x16x8xf32>
    %32 = vector.extract_strided_slice %30 {offsets = [0, 1, 0], sizes = [16, 16, 8], strides = [1, 1, 1]} : vector<16x18x8xf32> to vector<16x16x8xf32>
    %33 = vector.extract_strided_slice %30 {offsets = [0, 2, 0], sizes = [16, 16, 8], strides = [1, 1, 1]} : vector<16x18x8xf32> to vector<16x16x8xf32>
    %34 = tpu.concatenate %31, %32, %33 in 2 : vector<16x16x8xf32>, vector<16x16x8xf32>, vector<16x16x8xf32> -> vector<16x16x24xf32>
    %35 = vector.shape_cast %34 : vector<16x16x24xf32> to vector<256x24xf32>
    %c2_34 = arith.constant 2 : index
    %c0_35 = arith.constant 0 : index
    %c0_36 = arith.constant 0 : index
    %36 = vector.load %arg2[%c2_34, %c0_35, %c0_36] : memref<3x24x8xf32, #tpu.memory_space<vmem>>, vector<1x24x8xf32>
    %37 = vector.shape_cast %36 : vector<1x24x8xf32> to vector<24x8xf32>
    %cst_37 = arith.constant dense<0.000000e+00> : vector<256x8xf32>
    %38 = tpu.matmul %35, %37, %cst_37 {dimension_numbers = #tpu.dot_dimension_numbers<[1], [0], [0], [1], [0, 0, 1, 1], [], []>} : vector<256x24xf32>, vector<24x8xf32>, vector<256x8xf32> -> vector<256x8xf32>
    %39 = arith.addf %29, %38 : vector<256x8xf32>
    %40 = vector.shape_cast %39 : vector<256x8xf32> to vector<16x16x8xf32>
    %c0_38 = arith.constant 0 : index
    %c0_39 = arith.constant 0 : index
    %c0_40 = arith.constant 0 : index
    %c0_41 = arith.constant 0 : index
    %41 = vector.load %arg3[%c0_38, %c0_39, %c0_40, %c0_41] : memref<1x16x16x8xf32, #tpu.memory_space<vmem>>, vector<1x16x16x8xf32>
    %42 = vector.shape_cast %41 : vector<1x16x16x8xf32> to vector<16x16x8xf32>
    %43 = vector.shape_cast %40 : vector<16x16x8xf32> to vector<1x16x16x8xf32>
    tpu.vector_store %arg3[%c0_38, %c0_39, %c0_40, %c0_41], %43 {strides = array<i32>} : memref<1x16x16x8xf32, #tpu.memory_space<vmem>>, vector<1x16x16x8xf32>,
    %cst_42 = arith.constant dense<0.000000e+00> : vector<8xf32>
    %44 = vector.multi_reduction <add>, %39, %cst_42 [0] : vector<256x8xf32> to vector<8xf32>
    %45 = vector.shape_cast %44 : vector<8xf32> to vector<1x8xf32>
    %46 = arith.mulf %39, %39 : vector<256x8xf32>
    %cst_43 = arith.constant dense<0.000000e+00> : vector<8xf32>
    %47 = vector.multi_reduction <add>, %46, %cst_43 [0] : vector<256x8xf32> to vector<8xf32>
    %48 = vector.shape_cast %47 : vector<8xf32> to vector<1x8xf32>
    %49 = tpu.concatenate %45, %48 in 0 : vector<1x8xf32>, vector<1x8xf32> -> vector<2x8xf32>
    %c0_44 = arith.constant 0 : index
    %c0_45 = arith.constant 0 : index
    %c0_46 = arith.constant 0 : index
    %50 = vector.load %arg4[%c0_44, %c0_45, %c0_46] : memref<1x2x8xf32, #tpu.memory_space<vmem>>, vector<1x2x8xf32>
    %51 = vector.shape_cast %50 : vector<1x2x8xf32> to vector<2x8xf32>
    %52 = vector.shape_cast %49 : vector<2x8xf32> to vector<1x2x8xf32>
    tpu.vector_store %arg4[%c0_44, %c0_45, %c0_46], %52 {strides = array<i32>} : memref<1x2x8xf32, #tpu.memory_space<vmem>>, vector<1x2x8xf32>,
    return
  }
  func.func @transform_0(%arg0: i32) -> (i32, i32, i32, i32) {
    %c0_i32 = arith.constant 0 : i32
    %c0_i32_0 = arith.constant 0 : i32
    %c0_i32_1 = arith.constant 0 : i32
    %c0_i32_2 = arith.constant 0 : i32
    return %arg0, %c0_i32, %c0_i32_0, %c0_i32_1 : i32, i32, i32, i32
  }
  func.func @transform_1(%arg0: i32) -> (i32, i32, i32) {
    %c0_i32 = arith.constant 0 : i32
    %c0_i32_0 = arith.constant 0 : i32
    %c0_i32_1 = arith.constant 0 : i32
    %c0_i32_2 = arith.constant 0 : i32
    return %c0_i32, %c0_i32_0, %c0_i32_1 : i32, i32, i32
  }
  func.func @transform_2(%arg0: i32) -> (i32, i32, i32, i32) {
    %c0_i32 = arith.constant 0 : i32
    %c0_i32_0 = arith.constant 0 : i32
    %c0_i32_1 = arith.constant 0 : i32
    %c0_i32_2 = arith.constant 0 : i32
    return %arg0, %c0_i32, %c0_i32_0, %c0_i32_1 : i32, i32, i32, i32
  }
  func.func @transform_3(%arg0: i32) -> (i32, i32, i32) {
    %c0_i32 = arith.constant 0 : i32
    %c0_i32_0 = arith.constant 0 : i32
    %c0_i32_1 = arith.constant 0 : i32
    return %arg0, %c0_i32, %c0_i32_0 : i32, i32, i32
  }
}

</mosaic_0001>

<bundles_post_ra>
// kernel: tpu_custom_call.1
= control target key start
LH: loop header
LB: loop body
LE: loop exit
PB: predicated region body
PF: predicated region fallthrough
CT: control target
= control target key end

     0   :  { %9 = vsyncpa [#allocation4], 0  ;;  %s5426_s0 = inlined_call_operand.vmem [shape: f32[2,16,16,8], index: 0, kind: input, shape index: {}]   ;;  %s5427_s1 = inlined_call_operand.vmem [shape: f32[3,24,8], index: 1, kind: input, shape index: {}]   ;;  %s5428_s2 = inlined_call_operand.vmem [shape: f32[2,16,16,8], index: 2, kind: output, shape index: {0}]   ;;  %s5429_s3 = inlined_call_operand.hbm [shape: f32[2,2,8], index: 3, kind: output, shape index: {1}]  }
   0x1   :  { %11 = vsyncpa [#allocation4 + $0x1], 0  ;;  %s3683_s12 = smov 0   ;;  %s3685_s13 = smov 0  }
   0x2   :  { %s3687_s14 = smov 0   ;;  %s3689_s15 = smov 0  }
   0x3 LB: > { %s3704_s16 = sadd.s32 4294967295, %s3657_s15   ;;  %s3147_s17 = sadd.s32 4294967294, %s3657_s15   ;;  %s3657_s15 = sphi %s3689_s15, %s5490_s15   ;;  %s3653_s14 = sphi %s3687_s14, %s5489_s14   ;;  %s3649_s13 = sphi %s3685_s13, %s5488_s13   ;;  %s3645_s12 = sphi %s3683_s12, %s5487_s12  }
   0x4   : > { %s3708_s18 = sadd.s32 1, %s3657_s15   ;;  %s97_s19 = sadd.s32 1, %s3653_s14 }
   0x5   : > { %s94_s20 = ssub.s32 %s3657_s15, %s3708_s18  ;;  %p107_p0 = scmp.ne.s32.totalorder %s3653_s14, %s3649_s13 }
   0x6   : > { %p95_p1 = scmp.eq.s32.totalorder %s94_s20, 0  ;;  %p108_p2 = scmp.eq.s32.totalorder %s3704_s16, 1 }
   0x7   : > { %p113_p3 = scmp.ne.s32.totalorder %s3649_s13, %s3645_s12  ;;  %p114_p4 = scmp.eq.s32.totalorder %s3147_s17, 1 }
   0x8   : > { %s3719_s21 = scalar_select %p95_p1, %s3653_s14, %s97_s19  }
   0x9   : > { %p3721_p5 = por %p108_p2, %p107_p0  ;;  %p3725_p6 = por %p114_p4, %p113_p3 }
   0xa   : > { %p3150_p7 = scmp.ge.s32.totalorder %s3657_s15, 1  ;;  %p143_p8 = scmp.lt.s32.totalorder %s3657_s15, 3 }
   0xc   : > { %p144_p9 = pnand %p3150_p7, %p143_p8 }
   0xe   : > { %147 = sbr.rel (%p144_p9) target bundleno = 776 (0x308), region = 28 }
  0x13   : > { %vm214_vm0 = vcmask 64512   ;;  %vm217_vm1 = vcmask 58368   ;;  %p172_p10 = scmp.lt.s32.totalorder %s3704_s16, 1  ;;  %v3659_v0 = vmov 0.0   ;;  %vm224_vm2 = vcmask 57344   ;;  %s3660_s29 = smov 8  }
  0x14   : > { %215 = vst.msk [vmem:[#allocation2] sm:$0xff] %vm214_vm0, %v3659_v0  ;;  %216 = vst.msk [vmem:[#allocation2 + $0x8] sm:$0xff] %vm214_vm0, %v3659_v0  ;;  %vm385_vm3 = vcmask 1046528   ;;  %vm562_vm4 = vcmask 1045504   ;;  %s3661_s30 = smov 16   ;;  %vm771_vm5 = vcmask 130048  }
  0x15   : > { %220 = vst.msk [vmem:[#allocation2 + $0x198] sm:$0xff] %vm214_vm0, %v3659_v0  ;;  %221 = vst.msk [vmem:[#allocation2 + $0x1a0] sm:$0xff] %vm214_vm0, %v3659_v0  ;;  %s3739_s24 = scalar_select %p172_p10, %s3704_s16, 1  ;;  %vm1323_vm6 = vcmask 195584   ;;  %vm3038_vm7 = vcmask 1040384  }
  0x16   : > { %218 = vst.msk [vmem:[#allocation2 + $0x10] sm:$0x3] %vm217_vm1, %v3659_v0  ;;  %222 = vst.msk [vmem:[#allocation2 + $0x1a8] sm:$0x3] %vm217_vm1, %v3659_v0  ;;  %s3259_s9 = sshll.u32 %s3704_s16, 5  ;;  %s3662_s16 = smov [#allocation3]  }
  0x17   : > { %225 = vst.msk [vmem:[#allocation2 + $0x18] sm:$0x1] %vm224_vm2, %v3659_v0  ;;  %226 = vst.msk [vmem:[#allocation2 + $0x30] sm:$0x1] %vm224_vm2, %v3659_v0  ;;  %s3262_s25 = sshll.u32 %s3739_s24, 8  ;;  %s169_s24 = sand.u32 1, %s3649_s13  }
  0x18   : > { %227 = vst.msk [vmem:[#allocation2 + $0x48] sm:$0x1] %vm224_vm2, %v3659_v0  ;;  %228 = vst.msk [vmem:[#allocation2 + $0x60] sm:$0x1] %vm224_vm2, %v3659_v0  ;;  %s3779_s28 = scalar_lea.vmem %s5426_s0, %s3262_s25  ;;  %s5186_s8 = scalar_lea.vmem %s5428_s2, %s3262_s25 }
  0x19   : > { %229 = vst.msk [vmem:[#allocation2 + $0x78] sm:$0x1] %vm224_vm2, %v3659_v0  ;;  %230 = vst.msk [vmem:[#allocation2 + $0x90] sm:$0x1] %vm224_vm2, %v3659_v0  ;;  %v182_v1 = vld [vmem:[%s3779_s28] sm:$0xff]  ;;  %v183_v2 = vld [vmem:[%s3779_s28 + $0x8] sm:$0xff]  ;;  %s5390_s20 = scalar_lea.hbm %s5429_s3, %s3259_s9 }
  0x1a   : > { %231 = vst.msk [vmem:[#allocation2 + $0xa8] sm:$0x1] %vm224_vm2, %v3659_v0  ;;  %232 = vst.msk [vmem:[#allocation2 + $0xc0] sm:$0x1] %vm224_vm2, %v3659_v0  ;;  %v184_v3 = vld [vmem:[%s3779_s28 + $0x10] sm:$0xff]  ;;  %v185_v4 = vld [vmem:[%s3779_s28 + $0x18] sm:$0xff] }
  0x1b   : > { %233 = vst.msk [vmem:[#allocation2 + $0xd8] sm:$0x1] %vm224_vm2, %v3659_v0  ;;  %234 = vst.msk [vmem:[#allocation2 + $0xf0] sm:$0x1] %vm224_vm2, %v3659_v0  ;;  %v198_v5 = vld [vmem:[%s3779_s28 + $0x80] sm:$0xff]  ;;  %v199_v6 = vld [vmem:[%s3779_s28 + $0x88] sm:$0xff] }
  0x1c   : > { %235 = vst.msk [vmem:[#allocation2 + $0x108] sm:$0x1] %vm224_vm2, %v3659_v0  ;;  %236 = vst.msk [vmem:[#allocation2 + $0x120] sm:$0x1] %vm224_vm2, %v3659_v0  ;;  %v3790_v7 = vld [vmem:[#allocation2] sm:$0xff]  ;;  %v3792_v8 = vld [vmem:[#allocation2 + $0x8] sm:$0xff] }
  0x1d   : > { %237 = vst.msk [vmem:[#allocation2 + $0x138] sm:$0x1] %vm224_vm2, %v3659_v0  ;;  %238 = vst.msk [vmem:[#allocation2 + $0x150] sm:$0x1] %vm224_vm2, %v3659_v0  ;;  %v3794_v9 = vld [vmem:[#allocation2 + $0x10] sm:$0x3] }
  0x1e   : > { %239 = vst.msk [vmem:[#allocation2 + $0x168] sm:$0x1] %vm224_vm2, %v3659_v0  ;;  %240 = vst.msk [vmem:[#allocation2 + $0x180] sm:$0x1] %vm224_vm2, %v3659_v0  ;;  %v386_v10 = vrot.slane %v3790_v7, 1  ;;  %v387_v11 = vrot.slane %v3792_v8, 1 }
  0x1f   : > { %241 = vst.msk [vmem:[#allocation2 + $0x29] sm:$0x1] %vm224_vm2, %v3659_v0  ;;  %242 = vst.msk [vmem:[#allocation2 + $0x41] sm:$0x1] %vm224_vm2, %v3659_v0  ;;  %v389_v12 = vrot.slane %v3794_v9, 1  ;;  %v200_v13 = vld [vmem:[%s3779_s28 + $0x90] sm:$0xff] }
  0x20   : > { %243 = vst.msk [vmem:[#allocation2 + $0x59] sm:$0x1] %vm224_vm2, %v3659_v0  ;;  %244 = vst.msk [vmem:[#allocation2 + $0x71] sm:$0x1] %vm224_vm2, %v3659_v0  ;;  %v201_v14 = vld [vmem:[%s3779_s28 + $0x98] sm:$0xff]  ;;  %v202_v15 = vld [vmem:[%s3779_s28 + $0xa0] sm:$0xff]  ;;  %v388_v19 = vsel %vm385_vm3, %v386_v10, %v387_v11 }
  0x21   : > { %245 = vst.msk [vmem:[#allocation2 + $0x89] sm:$0x1] %vm224_vm2, %v3659_v0  ;;  %246 = vst.msk [vmem:[#allocation2 + $0xa1] sm:$0x1] %vm224_vm2, %v3659_v0  ;;  %v203_v16 = vld [vmem:[%s3779_s28 + $0xa8] sm:$0xff]  ;;  %v186_v17 = vld [vmem:[%s3779_s28 + $0x20] sm:$0xff]  ;;  %466 = vrot.lane.b32.xlu0 %v388_v19, %s3660_s29  ;;  %v390_v26 = vsel %vm385_vm3, %v387_v11, %v389_v12 }
  0x22   : > { %247 = vst.msk [vmem:[#allocation2 + $0xb9] sm:$0x1] %vm224_vm2, %v3659_v0  ;;  %248 = vst.msk [vmem:[#allocation2 + $0xd1] sm:$0x1] %vm224_vm2, %v3659_v0  ;;  %v187_v18 = vld [vmem:[%s3779_s28 + $0x28] sm:$0xff]  ;;  %v204_v20 = vld [vmem:[%s3779_s28 + $0xb0] sm:$0xff] }
  0x23   : > { %249 = vst.msk [vmem:[#allocation2 + $0xe9] sm:$0x1] %vm224_vm2, %v3659_v0  ;;  %250 = vst.msk [vmem:[#allocation2 + $0x101] sm:$0x1] %vm224_vm2, %v3659_v0  ;;  %v205_v21 = vld [vmem:[%s3779_s28 + $0xb8] sm:$0xff]  ;;  %v188_v22 = vld [vmem:[%s3779_s28 + $0x30] sm:$0xff] }
  0x24   : > { %251 = vst.msk [vmem:[#allocation2 + $0x119] sm:$0x1] %vm224_vm2, %v3659_v0  ;;  %252 = vst.msk [vmem:[#allocation2 + $0x131] sm:$0x1] %vm224_vm2, %v3659_v0  ;;  %v189_v23 = vld [vmem:[%s3779_s28 + $0x38] sm:$0xff]  ;;  %v206_v24 = vld [vmem:[%s3779_s28 + $0xc0] sm:$0xff] }
  0x25   : > { %253 = vst.msk [vmem:[#allocation2 + $0x149] sm:$0x1] %vm224_vm2, %v3659_v0  ;;  %254 = vst.msk [vmem:[#allocation2 + $0x161] sm:$0x1] %vm224_vm2, %v3659_v0  ;;  %v207_v25 = vld [vmem:[%s3779_s28 + $0xc8] sm:$0xff]  ;;  %v190_v27 = vld [vmem:[%s3779_s28 + $0x40] sm:$0xff]  ;;  %468 = vrot.lane.b32.xlu0 %v390_v26, %s3660_s29 }
  0x26   : > { %255 = vst.msk [vmem:[#allocation2 + $0x179] sm:$0x1] %vm224_vm2, %v3659_v0  ;;  %256 = vst.msk [vmem:[#allocation2 + $0x191] sm:$0x1] %vm224_vm2, %v3659_v0  ;;  %v191_v28 = vld [vmem:[%s3779_s28 + $0x48] sm:$0xff]  ;;  %v208_v29 = vld [vmem:[%s3779_s28 + $0xd0] sm:$0xff] }
  0x27   : > { %257 = vst.msk [vmem:[#allocation2 + $0x19] sm:$0xff] %vm214_vm0, %v182_v1  ;;  %258 = vst.msk [vmem:[#allocation2 + $0x21] sm:$0xff] %vm214_vm0, %v183_v2  ;;  %v209_v58 = vld [vmem:[%s3779_s28 + $0xd8] sm:$0xff]  ;;  %v192_v60 = vld [vmem:[%s3779_s28 + $0x50] sm:$0xff]  ;;  %s3151_s25 = sshll.u32 %s169_s24, 1  ;;  %s3047_s26 = scalar_lea.sflag [#allocation4], %s169_s24 }
  0x28   : > { %259 = vst.msk [vmem:[#allocation2 + $0x31] sm:$0xff] %vm214_vm0, %v184_v3  ;;  %260 = vst.msk [vmem:[#allocation2 + $0x39] sm:$0xff] %vm214_vm0, %v185_v4  ;;  %v193_v61 = vld [vmem:[%s3779_s28 + $0x58] sm:$0xff]  ;;  %v210_v62 = vld [vmem:[%s3779_s28 + $0xe0] sm:$0xff]  ;;  %s171_s10 = scalar_lea.vmem [#allocation3], %s3151_s25 }
  0x29   : > { %273 = vst.msk [vmem:[#allocation2 + $0xd9] sm:$0xff] %vm214_vm0, %v198_v5  ;;  %274 = vst.msk [vmem:[#allocation2 + $0xe1] sm:$0xff] %vm214_vm0, %v199_v6  ;;  %v211_v63 = vld [vmem:[%s3779_s28 + $0xe8] sm:$0xff]  ;;  %v194_v0 = vld [vmem:[%s3779_s28 + $0x60] sm:$0xff]  ;;  %s3063_s11 = sshll.u32 %s171_s10, 4  ;;  %s3064_s11 = int_to_ptr.vmem [resolvable:$true] %s3063_s11 }
  0x2a   : > { %275 = vst.msk [vmem:[#allocation2 + $0xf1] sm:$0xff] %vm214_vm0, %v200_v13  ;;  %276 = vst.msk [vmem:[#allocation2 + $0xf9] sm:$0xff] %vm214_vm0, %v201_v14  ;;  %v195_v1 = vld [vmem:[%s3779_s28 + $0x68] sm:$0xff]  ;;  %v212_v5 = vld [vmem:[%s3779_s28 + $0xf0] sm:$0xff]  ;;  %s3597_s27 = scalar_lea.vmem %s3064_s11, 32 }
  0x2b   : > { %277 = vst.msk [vmem:[#allocation2 + $0x109] sm:$0xff] %vm214_vm0, %v202_v15  ;;  %278 = vst.msk [vmem:[#allocation2 + $0x111] sm:$0xff] %vm214_vm0, %v203_v16  ;;  %v213_v6 = vld [vmem:[%s3779_s28 + $0xf8] sm:$0xff]  ;;  %v3158_v10 = vld [vmem:[%s5427_s1 + $0x28] sm:$0xff]  ;;  %p3598_p11 = scmp.ne.s32.totalorder %s3064_s11, %s3597_s27 }
  0x2c   : > { %261 = vst.msk [vmem:[#allocation2 + $0x49] sm:$0xff] %vm214_vm0, %v186_v17  ;;  %262 = vst.msk [vmem:[#allocation2 + $0x51] sm:$0xff] %vm214_vm0, %v187_v18  ;;  %3531 = vmatprep.subr.mxu1 %v3158_v10  ;;  %v3157_v11 = vld [vmem:[%s5427_s1 + $0x20] sm:$0xff]  ;;  %v196_v12 = vld [vmem:[%s3779_s28 + $0x70] sm:$0xff]  ;;  %3369 = vmatprep.subr.mxu0 %v3158_v10 }
  0x2d   : > { %279 = vst.msk [vmem:[#allocation2 + $0x121] sm:$0xff] %vm214_vm0, %v204_v20  ;;  %280 = vst.msk [vmem:[#allocation2 + $0x129] sm:$0xff] %vm214_vm0, %v205_v21  ;;  %3534 = vmatpush3.msra.mxu1 %v3158_v10  ;;  %v3156_v14 = vld [vmem:[%s5427_s1 + $0x18] sm:$0xff]  ;;  %3370 = vmatpush3.msra.mxu0 %v3158_v10  ;;  %p3599_p12 = pnand %p3598_p11, %p3721_p5 }
  0x2e   : > { %263 = vst.msk [vmem:[#allocation2 + $0x61] sm:$0xff] %vm214_vm0, %v188_v22  ;;  %264 = vst.msk [vmem:[#allocation2 + $0x69] sm:$0xff] %vm214_vm0, %v189_v23  ;;  %v3832_v30 = vld [vmem:[#allocation2 + $0x18] sm:$0xff]  ;;  %v3834_v31 = vld [vmem:[#allocation2 + $0x20] sm:$0xff]  ;;  %3532 = vmatprep.subr.mxu1 %v3157_v11  ;;  %3371 = vmatprep.subr.mxu0 %v3157_v11 }
  0x2f   : > { %281 = vst.msk [vmem:[#allocation2 + $0x139] sm:$0xff] %vm214_vm0, %v206_v24  ;;  %282 = vst.msk [vmem:[#allocation2 + $0x141] sm:$0xff] %vm214_vm0, %v207_v25  ;;  %v3836_v32 = vld [vmem:[#allocation2 + $0x30] sm:$0xff]  ;;  %v391_v33 = vrot.slane %v3832_v30, 1  ;;  %v3843_v34 = vrot.slane %v3834_v31, 1  ;;  %v3845_v35 = vld [vmem:[#allocation2 + $0x38] sm:$0xff]  ;;  %3535 = vmatpush3.msra.mxu1 %v3157_v11  ;;  %3372 = vmatpush3.msra.mxu0 %v3157_v11  ;;  %p3600_p13 = pneg %p3599_p12 }
  0x30   : > { %265 = vst.msk [vmem:[#allocation2 + $0x79] sm:$0xff] %vm214_vm0, %v190_v27  ;;  %266 = vst.msk [vmem:[#allocation2 + $0x81] sm:$0xff] %vm214_vm0, %v191_v28  ;;  %v396_v36 = vrot.slane %v3836_v32, 1  ;;  %v3848_v37 = vld [vmem:[#allocation2 + $0x28] sm:$0x3]  ;;  %v3852_v38 = vrot.slane %v3845_v35, 1  ;;  %3533 = vmatprep.subr.mxu1 %v3156_v14  ;;  %3373 = vmatprep.subr.mxu0 %v3156_v14 }
  0x31   : > { %283 = vst.msk [vmem:[#allocation2 + $0x151] sm:$0xff] %vm214_vm0, %v208_v29  ;;  %v394_v39 = vrot.slane %v3848_v37, 1  ;;  %v3855_v40 = vld [vmem:[#allocation2 + $0xd8] sm:$0xff]  ;;  %v3857_v41 = vld [vmem:[#allocation2 + $0xe0] sm:$0xff]  ;;  %v3863_v43 = vsel %vm385_vm3, %v391_v33, %v3843_v34  ;;  %v833_v49 = vld [vmem:[#allocation2 + $0xe8] sm:$0x3]  ;;  %3536 = vmatpush3.msra.mxu1 %v3156_v14  ;;  %3374 = vmatpush3.msra.mxu0 %v3156_v14 }
  0x32   : > { %v3859_v42 = vld [vmem:[#allocation2 + $0x40] sm:$0x3]  ;;  %v943_v44 = vrot.slane %v3855_v40, 1  ;;  %v944_v45 = vrot.slane %v3857_v41, 1  ;;  %470 = vrot.lane.b32.xlu1 %v3863_v43, %s3660_s29  ;;  %v3871_v46 = vsel %vm385_vm3, %v396_v36, %v3852_v38  ;;  %v1119_v51 = vrot.slane %v3855_v40, 2  ;;  %284 = vst.msk [vmem:[#allocation2 + $0x159] sm:$0xff] %vm214_vm0, %v209_v58 }
  0x33   : > { %v395_v47 = vsel %vm385_vm3, %v3843_v34, %v394_v39  ;;  %v399_v48 = vrot.slane %v3859_v42, 1  ;;  %474 = vrot.lane.b32.xlu0 %v3871_v46, %s3660_s29  ;;  %v1120_v52 = vrot.slane %v3857_v41, 2  ;;  %v946_v54 = vrot.slane %v833_v49, 1  ;;  %v809_v57 = vld [vmem:[#allocation2 + $0x28] sm:$0x3]  ;;  %267 = vst.msk [vmem:[#allocation2 + $0x91] sm:$0xff] %vm214_vm0, %v192_v60 }
  0x34   : > { %v945_v50 = vsel %vm385_vm3, %v943_v44, %v944_v45  ;;  %v1122_v56 = vrot.slane %v833_v49, 2  ;;  %268 = vst.msk [vmem:[#allocation2 + $0x99] sm:$0xff] %vm214_vm0, %v193_v61  ;;  %285 = vst.msk [vmem:[#allocation2 + $0x169] sm:$0xff] %vm214_vm0, %v210_v62  ;;  %v1079_v3 = vrot.slane %v3832_v30, 2  ;;  %v3903_v4 = vrot.slane %v3834_v31, 2  ;;  %v197_v15 = vld [vmem:[%s3779_s28 + $0x78] sm:$0xff] }
  0x35   : > { %v400_v53 = vsel %vm385_vm3, %v3852_v38, %v399_v48  ;;  %v1121_v55 = vsel %vm562_vm4, %v1119_v51, %v1120_v52  ;;  %v947_v59 = vsel %vm385_vm3, %v944_v45, %v946_v54  ;;  %286 = vst.msk [vmem:[#allocation2 + $0x171] sm:$0xff] %vm214_vm0, %v211_v63  ;;  %269 = vst.msk [vmem:[#allocation2 + $0xa9] sm:$0xff] %vm214_vm0, %v194_v0  ;;  %v906_v13 = vrot.slane %v809_v57, 1  ;;  %v3926_v16 = vld [vmem:[#allocation2 + $0xf0] sm:$0xff]  ;;  %v3928_v17 = vld [vmem:[#allocation2 + $0xf8] sm:$0xff]  ;;  %s3601_s28 = sshll.u32 %s3662_s16, 4  ;;  %s3602_s28 = int_to_ptr.vmem [resolvable:$false] %s3601_s28 }
  0x36   : > { %472 = vrot.lane.b32.xlu1 %v395_v47, %s3660_s29  ;;  %v1123_v2 = vsel %vm562_vm4, %v1120_v52, %v1122_v56  ;;  %270 = vst.msk [vmem:[#allocation2 + $0xb1] sm:$0xff] %vm214_vm0, %v195_v1  ;;  %287 = vst.msk [vmem:[#allocation2 + $0x181] sm:$0xff] %vm214_vm0, %v212_v5  ;;  %v3933_v18 = vsel %vm562_vm4, %v1079_v3, %v3903_v4  ;;  %v1082_v19 = vrot.slane %v809_v57, 2  ;;  %v948_v21 = vrot.slane %v3926_v16, 1  ;;  %v836_v23 = vld [vmem:[#allocation2 + $0x100] sm:$0x3]  ;;  %p3604_p0 = scmp.lt.s32.totalorder %s3064_s11, %s3602_s28 }
  0x37   : > { %1015 = vrot.lane.b32.xlu0 %v945_v50, %s3660_s29  ;;  %288 = vst.msk [vmem:[#allocation2 + $0x189] sm:$0xff] %vm214_vm0, %v213_v6  ;;  %271 = vst.msk [vmem:[#allocation2 + $0xc1] sm:$0xff] %vm214_vm0, %v196_v12  ;;  %v907_v20 = vsel %vm385_vm3, %v3843_v34, %v906_v13  ;;  %v949_v22 = vrot.slane %v3928_v17, 1  ;;  %v1124_v25 = vrot.slane %v3926_v16, 2  ;;  %v1125_v26 = vrot.slane %v3928_v17, 2  ;;  %v3961_v47 = vld [vmem:[#allocation2 + $0x108] sm:$0xff] }
  0x38   : > { %272 = vst.msk [vmem:[#allocation2 + $0xc9] sm:$0xff] %vm214_vm0, %v197_v15  ;;  %v1083_v24 = vsel %vm562_vm4, %v3903_v4, %v1082_v19  ;;  %v951_v28 = vrot.slane %v836_v23, 1  ;;  %v1127_v33 = vrot.slane %v836_v23, 2  ;;  %v812_v36 = vld [vmem:[#allocation2 + $0x40] sm:$0x3]  ;;  %v3957_v44 = vrot.slane %v3845_v35, 2 }
  0x39   : > { %v950_v27 = vsel %vm385_vm3, %v948_v21, %v949_v22  ;;  %v1126_v29 = vsel %vm562_vm4, %v1124_v25, %v1125_v26  ;;  %v911_v45 = vrot.slane %v812_v36, 1  ;;  %v3963_v48 = vld [vmem:[#allocation2 + $0x110] sm:$0xff]  ;;  %v1087_v50 = vrot.slane %v812_v36, 2  ;;  %v839_v54 = vld [vmem:[#allocation2 + $0x118] sm:$0x3]  ;;  %v3984_v60 = vld [vmem:[#allocation2 + $0x48] sm:$0xff] }
  0x3a   : > { %476 = vrot.lane.b32.xlu1 %v400_v53, %s3660_s29  ;;  %v952_v34 = vsel %vm385_vm3, %v949_v22, %v951_v28  ;;  %v1128_v39 = vsel %vm562_vm4, %v1125_v26, %v1127_v33  ;;  %v953_v52 = vrot.slane %v3961_v47, 1  ;;  %v954_v53 = vrot.slane %v3963_v48, 1  ;;  %v3986_v61 = vld [vmem:[#allocation2 + $0x50] sm:$0xff]  ;;  %v815_v5 = vld [vmem:[#allocation2 + $0x58] sm:$0x3]  ;;  %v4019_v15 = vld [vmem:[#allocation2 + $0x128] sm:$0xff] }
  0x3b   : > { %1191 = vrot.lane.b32.xlu0 %v1121_v55, %s3661_s30  ;;  %v912_v51 = vsel %vm385_vm3, %v3852_v38, %v911_v45  ;;  %v1088_v55 = vsel %vm562_vm4, %v3957_v44, %v1087_v50  ;;  %v1129_v56 = vrot.slane %v3961_v47, 2  ;;  %v1130_v57 = vrot.slane %v3963_v48, 2  ;;  %v4040_v33 = vld [vmem:[#allocation2 + $0x60] sm:$0xff]  ;;  %s3603_s4 = scalar_lea.vmem %s3602_s28, 64 }
  0x3c   : > { %v955_v58 = vsel %vm385_vm3, %v953_v52, %v954_v53  ;;  %v1132_v63 = vrot.slane %v839_v54, 2  ;;  %v571_v0 = vrot.slane %v3848_v37, 2  ;;  %v3994_v3 = vrot.slane %v3986_v61, 1  ;;  %p3605_p1 = scmp.lt.s32.totalorder %s3603_s4, %s3597_s27 }
  0x3d   : > { %v1131_v62 = vsel %vm562_vm4, %v1129_v56, %v1130_v57  ;;  %v576_v10 = vrot.slane %v3859_v42, 2  ;;  %v1089_v37 = vrot.slane %v3984_v60, 2  ;;  %v4005_v12 = vrot.slane %v3986_v61, 2  ;;  %v4017_v42 = vld [vmem:[#allocation2 + $0x120] sm:$0xff] }
  0x3e   : > { %1017 = vrot.lane.b32.xlu1 %v947_v59, %s3660_s29  ;;  %v956_v59 = vrot.slane %v839_v54, 1  ;;  %v3999_v6 = vsel %vm562_vm4, %v3903_v4, %v571_v0  ;;  %v1133_v11 = vsel %vm562_vm4, %v1130_v57, %v1132_v63  ;;  %v916_v4 = vrot.slane %v815_v5, 1  ;;  %v4063_v57 = vld [vmem:[#allocation2 + $0x138] sm:$0xff]  ;;  %p3606_p2 = por %p3605_p1, %p3604_p0 }
  0x3f   : > { %1193 = vrot.lane.b32.xlu0 %v1123_v2, %s3661_s30  ;;  %v913_v2 = vrot.slane %v3984_v60, 1  ;;  %v4010_v13 = vsel %vm562_vm4, %v3957_v44, %v576_v10  ;;  %v4023_v19 = vsel %vm562_vm4, %v1089_v37, %v4005_v12  ;;  %v958_v22 = vrot.slane %v4017_v42, 1 }
  0x40   : > { %v957_v1 = vsel %vm385_vm3, %v954_v53, %v956_v59  ;;  %v917_v21 = vsel %vm385_vm3, %v3994_v3, %v916_v4  ;;  %v959_v23 = vrot.slane %v4019_v15, 1  ;;  %v1134_v26 = vrot.slane %v4017_v42, 2  ;;  %p3607_p3 = pnand %p3606_p2, %p3600_p13 }
  0x41   : > { %v4014_v14 = vsel %vm385_vm3, %v913_v2, %v3994_v3  ;;  %v918_v45 = vrot.slane %v4040_v33, 1  ;;  %v1094_v53 = vrot.slane %v4040_v33, 2  ;;  %v963_v0 = vrot.slane %v4063_v57, 1  ;;  %v845_v2 = vld [vmem:[#allocation2 + $0x148] sm:$0x3] }
  0x42   : > { %983 = vrot.lane.b32.xlu1 %v3863_v43, %s3660_s29  ;;  %v1084_v43 = vrot.slane %v3836_v32, 2  ;;  %v960_v28 = vsel %vm385_vm3, %v958_v22, %v959_v23  ;;  %v1139_v10 = vrot.slane %v4063_v57, 2  ;;  %v966_v4 = vrot.slane %v845_v2, 1 }
  0x43   : > { %1159 = vrot.lane.b32.xlu0 %v3933_v18, %s3661_s30 }
  0x44   : > { %v3967_v49 = vsel %vm562_vm4, %v1084_v43, %v3957_v44 }
  0x46   : > { %985 = vrot.lane.b32.xlu1 %v907_v20, %s3660_s29  ;;  %v1092_v20 = vrot.slane %v815_v5, 2 }
  0x47   : > { %1161 = vrot.lane.b32.xlu0 %v1083_v24, %s3661_s30  ;;  %v842_v24 = vld [vmem:[#allocation2 + $0x130] sm:$0x3] }
  0x48   : > { %v1093_v25 = vsel %vm562_vm4, %v4005_v12, %v1092_v20  ;;  %v4086_v20 = vld [vmem:[#allocation2 + $0x78] sm:$0xff] }
  0x4a   : > { %1019 = vrot.lane.b32.xlu1 %v950_v27, %s3660_s29  ;;  %v1135_v27 = vrot.slane %v4019_v15, 2 }
  0x4b   : > { %1195 = vrot.lane.b32.xlu0 %v1126_v29, %s3661_s30  ;;  %v961_v29 = vrot.slane %v842_v24, 1 }
  0x4c   : > { %v1136_v36 = vsel %vm562_vm4, %v1134_v26, %v1135_v27 }
  0x4d   : > { %v962_v43 = vsel %vm385_vm3, %v959_v23, %v961_v29  ;;  %v1142_v23 = vrot.slane %v845_v2, 2  ;;  %v1099_v29 = vrot.slane %v4086_v20, 2 }
  0x4e   : > { %1021 = vrot.lane.b32.xlu1 %v952_v34, %s3660_s29  ;;  %v4042_v34 = vld [vmem:[#allocation2 + $0x68] sm:$0xff] }
  0x4f   : > { %1197 = vrot.lane.b32.xlu0 %v1128_v39, %s3661_s30  ;;  %v1137_v39 = vrot.slane %v842_v24, 2  ;;  %v4049_v50 = vrot.slane %v4042_v34, 1  ;;  %v4055_v54 = vrot.slane %v4042_v34, 2 }
  0x51   : > { %v1138_v52 = vsel %vm562_vm4, %v1135_v27, %v1137_v39  ;;  %v4069_v59 = vsel %vm562_vm4, %v1094_v53, %v4055_v54  ;;  %v821_v27 = vld [vmem:[#allocation2 + $0x88] sm:$0x3] }
  0x52   : > { %987 = vrot.lane.b32.xlu1 %v3871_v46, %s3660_s29  ;;  %v1102_v53 = vrot.slane %v821_v27, 2 }
  0x53   : > { %1163 = vrot.lane.b32.xlu0 %v3967_v49, %s3661_s30 }
  0x56   : > { %989 = vrot.lane.b32.xlu1 %v912_v51, %s3660_s29  ;;  %v818_v51 = vld [vmem:[#allocation2 + $0x70] sm:$0x3] }
  0x57   : > { %1165 = vrot.lane.b32.xlu0 %v1088_v55, %s3661_s30  ;;  %v4060_v55 = vsel %vm385_vm3, %v918_v45, %v4049_v50  ;;  %v921_v56 = vrot.slane %v818_v51, 1  ;;  %v4109_v45 = vld [vmem:[#allocation2 + $0x150] sm:$0xff] }
  0x58   : > { %v1144_v2 = vrot.slane %v4109_v45, 2 }
  0x59   : > { %v922_v63 = vsel %vm385_vm3, %v4049_v50, %v921_v56 }
  0x5a   : > { %1023 = vrot.lane.b32.xlu1 %v955_v58, %s3660_s29  ;;  %v4065_v58 = vld [vmem:[#allocation2 + $0x140] sm:$0xff] }
  0x5b   : > { %1199 = vrot.lane.b32.xlu0 %v1131_v62, %s3661_s30  ;;  %v1097_v62 = vrot.slane %v818_v51, 2  ;;  %v4111_v51 = vld [vmem:[#allocation2 + $0x158] sm:$0xff] }
  0x5c   : > { %5449 = vst [vmem:[#allocation6_spill] sm:$0xff] %v4111_v51 }
  0x5d   : > { %v1098_v5 = vsel %vm562_vm4, %v4055_v54, %v1097_v62  ;;  %v968_v62 = vrot.slane %v4109_v45, 1 }
  0x5e   : > { %1025 = vrot.lane.b32.xlu1 %v957_v1, %s3660_s29  ;;  %v964_v1 = vrot.slane %v4065_v58, 1 }
  0x5f   : > { %1201 = vrot.lane.b32.xlu0 %v1133_v11, %s3661_s30  ;;  %v1140_v11 = vrot.slane %v4065_v58, 2 }
  0x60   : > { %v965_v37 = vsel %vm385_vm3, %v963_v0, %v964_v1  ;;  %v967_v24 = vsel %vm385_vm3, %v964_v1, %v966_v4  ;;  %v848_v0 = vld [vmem:[#allocation2 + $0x160] sm:$0x3]  ;;  %v4134_v4 = vld [vmem:[#allocation2 + $0x98] sm:$0xff] }
  0x61   : > { %v1141_v22 = vsel %vm562_vm4, %v1139_v10, %v1140_v11  ;;  %5451 = vst [vmem:[#allocation8_spill] sm:$0xff] %v4134_v4 }
  0x62   : > { %991 = vrot.lane.b32.xlu1 %v4014_v14, %s3660_s29 }
  0x63   : > { %1167 = vrot.lane.b32.xlu0 %v4023_v19, %s3661_s30 }
  0x66   : > { %993 = vrot.lane.b32.xlu1 %v917_v21, %s3660_s29  ;;  %v4088_v21 = vld [vmem:[#allocation2 + $0x80] sm:$0xff] }
  0x67   : > { %1169 = vrot.lane.b32.xlu0 %v1093_v25, %s3661_s30  ;;  %v923_v25 = vrot.slane %v4086_v20, 1  ;;  %v4095_v26 = vrot.slane %v4088_v21, 1 }
  0x69   : > { %v4106_v39 = vsel %vm385_vm3, %v923_v25, %v4095_v26 }
  0x6a   : > { %1027 = vrot.lane.b32.xlu1 %v960_v28, %s3660_s29  ;;  %v1143_v28 = vsel %vm562_vm4, %v1140_v11, %v1142_v23  ;;  %v971_v11 = vrot.slane %v848_v0, 1  ;;  %v1147_v23 = vrot.slane %v848_v0, 2  ;;  %v4157_v0 = vld [vmem:[#allocation2 + $0x170] sm:$0xff] }
  0x6b   : > { %1203 = vrot.lane.b32.xlu0 %v1136_v36, %s3661_s30  ;;  %v4101_v36 = vrot.slane %v4088_v21, 2  ;;  %5453 = vst [vmem:[#allocation10_spill] sm:$0xff] %v4157_v0 }
  0x6d   : > { %v1103_v1 = vsel %vm562_vm4, %v4101_v36, %v1102_v53  ;;  %v4147_v53 = vrot.slane %v4134_v4, 2 }
  0x6e   : > { %1029 = vrot.lane.b32.xlu1 %v962_v43, %s3660_s29  ;;  %v926_v43 = vrot.slane %v821_v27, 1  ;;  %v4141_v27 = vrot.slane %v4134_v4, 1 }
  0x6f   : > { %1205 = vrot.lane.b32.xlu0 %v1138_v52, %s3661_s30  ;;  %v4115_v52 = vsel %vm562_vm4, %v1099_v29, %v4101_v36 }
  0x70   : > { %v927_v56 = vsel %vm385_vm3, %v4095_v26, %v926_v43 }
  0x72   : > { %995 = vrot.lane.b32.xlu1 %v4060_v55, %s3660_s29 }
  0x73   : > { %1171 = vrot.lane.b32.xlu0 %v4069_v59, %s3661_s30 }
  0x76   : > { %997 = vrot.lane.b32.xlu1 %v922_v63, %s3660_s29  ;;  %v969_v63 = vrot.slane %v4111_v51, 1 }
  0x77   : > { %1173 = vrot.lane.b32.xlu0 %v1098_v5, %s3661_s30  ;;  %v1145_v5 = vrot.slane %v4111_v51, 2 }
  0x78   : > { %v970_v10 = vsel %vm385_vm3, %v968_v62, %v969_v63 }
  0x79   : > { %v1148_v29 = vsel %vm562_vm4, %v1145_v5, %v1147_v23 }
  0x7a   : > { %1031 = vrot.lane.b32.xlu1 %v965_v37, %s3660_s29  ;;  %v4132_v37 = vld [vmem:[#allocation2 + $0x90] sm:$0xff] }
  0x7b   : > { %1207 = vrot.lane.b32.xlu0 %v1141_v22, %s3661_s30  ;;  %5450 = vst [vmem:[#allocation7_spill] sm:$0xff] %v4132_v37  ;;  %v1146_v22 = vsel %vm562_vm4, %v1144_v2, %v1145_v5  ;;  %v928_v25 = vrot.slane %v4132_v37, 1  ;;  %v1104_v43 = vrot.slane %v4132_v37, 2 }
  0x7e   : > { %1033 = vrot.lane.b32.xlu1 %v967_v24, %s3660_s29  ;;  %v972_v24 = vsel %vm385_vm3, %v969_v63, %v971_v11  ;;  %v4155_v63 = vld [vmem:[#allocation2 + $0x168] sm:$0xff]  ;;  %v974_v11 = vrot.slane %v4157_v0, 1 }
  0x7f   : > { %1209 = vrot.lane.b32.xlu0 %v1143_v28, %s3661_s30  ;;  %v824_v28 = vld [vmem:[#allocation2 + $0xa0] sm:$0x3]  ;;  %5452 = vst [vmem:[#allocation9_spill] sm:$0xff] %v4155_v63 }
  0x80   : > { %v931_v62 = vrot.slane %v824_v28, 1  ;;  %v1107_v2 = vrot.slane %v824_v28, 2 }
  0x82   : > { %999 = vrot.lane.b32.xlu1 %v4106_v39, %s3660_s29  ;;  %v932_v5 = vsel %vm385_vm3, %v4141_v27, %v931_v62  ;;  %v1108_v23 = vsel %vm562_vm4, %v4147_v53, %v1107_v2  ;;  %v4180_v62 = vld [vmem:[#allocation2 + $0xb0] sm:$0xff] }
  0x83   : > { %1175 = vrot.lane.b32.xlu0 %v4115_v52, %s3661_s30  ;;  %5455 = vst [vmem:[#allocation12_spill] sm:$0xff] %v4180_v62  ;;  %v4193_v51 = vrot.slane %v4180_v62, 2 }
  0x85   : > { %5457 = vst [vmem:[#allocation14_spill] sm:$0xff] %v4193_v51 }
  0x86   : > { %1001 = vrot.lane.b32.xlu1 %v927_v56, %s3660_s29  ;;  %v4152_v56 = vsel %vm385_vm3, %v928_v25, %v4141_v27  ;;  %v1150_v25 = vrot.slane %v4157_v0, 2 }
  0x87   : > { %1177 = vrot.lane.b32.xlu0 %v1103_v1, %s3661_s30  ;;  %v4161_v1 = vsel %vm562_vm4, %v1104_v43, %v4147_v53  ;;  %v4178_v43 = vld [vmem:[#allocation2 + $0xa8] sm:$0xff] }
  0x88   : > { %5454 = vst [vmem:[#allocation11_spill] sm:$0xff] %v4178_v43  ;;  %v933_v0 = vrot.slane %v4178_v43, 1 }
  0x8a   : > { %1035 = vrot.lane.b32.xlu1 %v970_v10, %s3660_s29  ;;  %v973_v10 = vrot.slane %v4155_v63, 1 }
  0x8b   : > { %1211 = vrot.lane.b32.xlu0 %v1146_v22, %s3661_s30  ;;  %v851_v22 = vld [vmem:[#allocation2 + $0x178] sm:$0x3] }
  0x8c   : > { %v975_v28 = vsel %vm385_vm3, %v973_v10, %v974_v11  ;;  %v1152_v37 = vrot.slane %v851_v22, 2  ;;  %v827_v10 = vld [vmem:[#allocation2 + $0xb8] sm:$0x3] }
  0x8e   : > { %1037 = vrot.lane.b32.xlu1 %v972_v24, %s3660_s29  ;;  %v1149_v24 = vrot.slane %v4155_v63, 2  ;;  %v1109_v63 = vrot.slane %v4178_v43, 2 }
  0x8f   : > { %1213 = vrot.lane.b32.xlu0 %v1148_v29, %s3661_s30  ;;  %v976_v29 = vrot.slane %v851_v22, 1 }
  0x90   : > { %v1151_v4 = vsel %vm562_vm4, %v1149_v24, %v1150_v25  ;;  %v936_v24 = vrot.slane %v827_v10, 1 }
  0x91   : > { %v977_v2 = vsel %vm385_vm3, %v974_v11, %v976_v29 }
  0x92   : > { %1003 = vrot.lane.b32.xlu1 %v4152_v56, %s3660_s29 }
  0x93   : > { %1179 = vrot.lane.b32.xlu0 %v4161_v1, %s3661_s30  ;;  %v4195_v22 = vpop.permute.xlu0 %466 }
  0x94   : > { %5458 = vst [vmem:[#allocation15_spill] sm:$0xff] %v4195_v22 }
  0x96   : > { %1005 = vrot.lane.b32.xlu1 %v932_v5, %s3660_s29  ;;  %v4187_v5 = vrot.slane %v4180_v62, 1 }
  0x97   : > { %1181 = vrot.lane.b32.xlu0 %v1108_v23, %s3661_s30  ;;  %v1153_v23 = vsel %vm562_vm4, %v1150_v25, %v1152_v37  ;;  %v4209_v37 = vsel %vm562_vm4, %v1109_v63, %v4193_v51  ;;  %v1112_v25 = vrot.slane %v827_v10, 2  ;;  %v4211_v29 = vpop.permute.xlu0 %468  ;;  %v854_v63 = vld [vmem:[#allocation2 + $0x190] sm:$0x3] }
  0x98   : > { %5456 = vst [vmem:[#allocation13_spill] sm:$0xff] %v4187_v5  ;;  %v4200_v11 = vsel %vm385_vm3, %v933_v0, %v4187_v5  ;;  %5462 = vst [vmem:[#allocation19_spill] sm:$0xff] %v4209_v37  ;;  %v937_v0 = vsel %vm385_vm3, %v4187_v5, %v936_v24  ;;  %v981_v5 = vrot.slane %v854_v63, 1 }
  0x99   : > { %5459 = vst [vmem:[#allocation16_spill] sm:$0xff] %v4200_v11  ;;  %5463 = vst [vmem:[#allocation20_spill] sm:$0xff] %v4211_v29  ;;  %v1113_v10 = vsel %vm562_vm4, %v4193_v51, %v1112_v25 }
  0x9a   : > { %1039 = vrot.lane.b32.xlu1 %v975_v28, %s3660_s29  ;;  %v4205_v28 = vld [vmem:[#allocation2 + $0x188] sm:$0xff] }
  0x9b   : > { %1215 = vrot.lane.b32.xlu0 %v1151_v4, %s3661_s30  ;;  %v4203_v4 = vld [vmem:[#allocation2 + $0x180] sm:$0xff]  ;;  %5461 = vst [vmem:[#allocation18_spill] sm:$0xff] %v4205_v28  ;;  %v1155_v62 = vrot.slane %v4205_v28, 2 }
  0x9c   : > { %5460 = vst [vmem:[#allocation17_spill] sm:$0xff] %v4203_v4  ;;  %v1154_v29 = vrot.slane %v4203_v4, 2 }
  0x9e   : > { %1041 = vrot.lane.b32.xlu1 %v977_v2, %s3660_s29  ;;  %v978_v2 = vrot.slane %v4203_v4, 1  ;;  %v1156_v25 = vsel %vm562_vm4, %v1154_v29, %v1155_v62  ;;  %v1157_v4 = vrot.slane %v854_v63, 2  ;;  %v830_v63 = vld [vmem:[#allocation2 + $0xd0] sm:$0x3] }
  0x9f   : > { %1217 = vrot.lane.b32.xlu0 %v1153_v23, %s3661_s30  ;;  %v979_v23 = vrot.slane %v4205_v28, 1 }
  0xa1   : > { %v980_v24 = vsel %vm385_vm3, %v978_v2, %v979_v23 }
  0xa2   : > { %1007 = vrot.lane.b32.xlu1 %v4200_v11, %s3660_s29  ;;  %v4236_v11 = vld [vmem:[#allocation2 + $0xc8] sm:$0xff] }
  0xa3   : > { %1183 = vrot.lane.b32.xlu0 %v4209_v37, %s3661_s30  ;;  %v4243_v2 = vrot.slane %v4236_v11, 1 }
  0xa4   : > { %v4221_v22 = vpop.permute.xlu1 %470 }
  0xa5   : > { %5464 = vst [vmem:[#allocation21_spill] sm:$0xff] %v4221_v22  ;;  %v4227_v43 = vpop.permute.xlu0 %474  ;;  %v4234_v22 = vld [vmem:[#allocation2 + $0xc0] sm:$0xff] }
  0xa6   : > { %5465 = vst [vmem:[#allocation22_spill] sm:$0xff] %v4227_v43  ;;  %1009 = vrot.lane.b32.xlu1 %v937_v0, %s3660_s29  ;;  %v982_v43 = vsel %vm385_vm3, %v979_v23, %v981_v5  ;;  %v938_v0 = vrot.slane %v4234_v22, 1  ;;  %v1158_v5 = vsel %vm562_vm4, %v1155_v62, %v1157_v4  ;;  %v1114_v23 = vrot.slane %v4234_v22, 2 }
  0xa7   : > { %1185 = vrot.lane.b32.xlu0 %v1113_v10, %s3661_s30  ;;  %v806_v10 = vld [vmem:[%s5427_s1 + $0x10] sm:$0xff] }
  0xa8   : > { %v4232_v37 = vpop.permute.xlu1 %472  ;;  %3423 = vmatprep.subr.mxu1 %v806_v10 }
  0xa9   : > { %5466 = vst [vmem:[#allocation23_spill] sm:$0xff] %v4232_v37  ;;  %v1016_v51 = vpop.permute.xlu0 %1015 }
  0xaa   : > { %1043 = vrot.lane.b32.xlu1 %v980_v24, %s3660_s29  ;;  %v1271_v37 = vsel %vm214_vm0, %v3855_v40, %v1016_v51  ;;  %v4256_v24 = vrot.slane %v4236_v11, 2  ;;  %v4262_v51 = vsel %vm385_vm3, %v938_v0, %v4243_v2 }
  0xab   : > { %1219 = vrot.lane.b32.xlu0 %v1156_v25, %s3661_s30  ;;  %v941_v25 = vrot.slane %v830_v63, 1 }
  0xac   : > { %v4251_v29 = vpop.permute.xlu1 %476  ;;  %v4270_v4 = vsel %vm562_vm4, %v1114_v23, %v4256_v24 }
  0xad   : > { %5467 = vst [vmem:[#allocation24_spill] sm:$0xff] %v4251_v29  ;;  %v1192_v28 = vpop.permute.xlu0 %1191 }
  0xae   : > { %1045 = vrot.lane.b32.xlu1 %v982_v43, %s3660_s29  ;;  %v1303_v40 = vsel %vm771_vm5, %v1271_v37, %v1192_v28  ;;  %v563_v43 = vrot.slane %v3790_v7, 2  ;;  %v564_v28 = vrot.slane %v3792_v8, 2  ;;  %v3225_v7 = vld [vmem:[%s5427_s1 + $0x40] sm:$0xff] }
  0xaf   : > { %1221 = vrot.lane.b32.xlu0 %v1158_v5, %s3661_s30  ;;  %3399 = vmatprep.mubr.msk.f32.mxu1 %vm1323_vm6, %v1303_v40  ;;  %v942_v5 = vsel %vm385_vm3, %v4243_v2, %v941_v25  ;;  %v1117_v40 = vrot.slane %v830_v63, 2  ;;  %v804_v25 = vld [vmem:[%s5427_s1] sm:$0xff] }
  0xb0   : > { %v1018_v29 = vpop.permute.xlu1 %1017  ;;  %v565_v23 = vsel %vm562_vm4, %v563_v43, %v564_v28  ;;  %3477 = vmatprep.subr.mxu0 %v3225_v7 }
  0xb1   : > { %v1272_v62 = vsel %vm214_vm0, %v3857_v41, %v1018_v29  ;;  %v1194_v37 = vpop.permute.xlu0 %1193  ;;  %v805_v41 = vld [vmem:[%s5427_s1 + $0x8] sm:$0xff] }
  0xb2   : > { %1011 = vrot.lane.b32.xlu1 %v4262_v51, %s3660_s29  ;;  %v1304_v0 = vsel %vm771_vm5, %v1272_v62, %v1194_v37  ;;  %v1118_v37 = vsel %vm562_vm4, %v4256_v24, %v1117_v40 }
  0xb3   : > { %1187 = vrot.lane.b32.xlu0 %v4270_v4, %s3661_s30  ;;  %3400 = vmatmul.mubr.msk.f32.vlgmr.msra.gmra.mxu1 %vm1323_vm6, %v1304_v0  ;;  %v566_v0 = vrot.slane %v3794_v9, 2 }
  0xb4   : > { %v984_v8 = vpop.permute.xlu1 %983  ;;  %3424 = vmatpush3.msra.mxu1 %v806_v10  ;;  %v1969_v10 = vld [vmem:[#allocation2 + $0x40] sm:$0x3] }
  0xb5   : > { %v1255_v29 = vsel %vm214_vm0, %v3832_v30, %v984_v8  ;;  %v1160_v63 = vpop.permute.xlu0 %1159  ;;  %3425 = vmatprep.subr.mxu1 %v805_v41  ;;  %v567_v40 = vsel %vm562_vm4, %v564_v28, %v566_v0  ;;  %v2066_v9 = vrot.slane %v1969_v10, 1  ;;  %v3223_v28 = vld [vmem:[%s5427_s1 + $0x30] sm:$0xff] }
  0xb6   : > { %1013 = vrot.lane.b32.xlu1 %v942_v5, %s3660_s29  ;;  %v1287_v62 = vsel %vm771_vm5, %v1255_v29, %v1160_v63  ;;  %3426 = vmatpush3.msra.mxu1 %v805_v41  ;;  %v3224_v41 = vld [vmem:[%s5427_s1 + $0x38] sm:$0xff] }
  0xb7   : > { %643 = vrot.lane.b32.xlu0 %v565_v23, %s3661_s30  ;;  %3375 = vmatprep.mubr.msk.f32.mxu0 %vm1323_vm6, %v1287_v62 }
  0xb8   : > { %v986_v30 = vpop.permute.xlu1 %985  ;;  %3427 = vmatprep.subr.mxu1 %v804_v25 }
  0xb9   : > { %v1256_v43 = vsel %vm214_vm0, %v3834_v31, %v986_v30  ;;  %v1162_v5 = vpop.permute.xlu0 %1161  ;;  %3428 = vmatpush3.msra.mxu1 %v804_v25  ;;  %v2242_v25 = vrot.slane %v1969_v10, 2  ;;  %v1972_v30 = vld [vmem:[#allocation2 + $0x58] sm:$0x3] }
  0xba   : > { %1189 = vrot.lane.b32.xlu1 %v1118_v37, %s3661_s30  ;;  %v1288_v8 = vsel %vm771_vm5, %v1256_v43, %v1162_v5  ;;  %v2071_v5 = vrot.slane %v1972_v30, 1 }
  0xbb   : > { %2143 = vrot.lane.b32.xlu0 %v3871_v46, %s3660_s29  ;;  %3376 = vmatmul.mubr.msk.f32.vlgmr.msra.gmra.mxu0 %vm1323_vm6, %v1288_v8  ;;  %v2067_v46 = vsel %vm385_vm3, %v3852_v38, %v2066_v9  ;;  %v2243_v38 = vsel %vm562_vm4, %v3957_v44, %v2242_v25  ;;  %v2247_v9 = vrot.slane %v1972_v30, 2 }
  0xbc   : > { %v1020_v31 = vpop.permute.xlu1 %1019  ;;  %3478 = vmatpush3.msra.mxu0 %v3225_v7 }
  0xbd   : > { %v1273_v29 = vsel %vm214_vm0, %v3926_v16, %v1020_v31  ;;  %v1196_v23 = vpop.permute.xlu0 %1195  ;;  %3479 = vmatprep.subr.mxu0 %v3224_v41 }
  0xbe   : > { %645 = vrot.lane.b32.xlu1 %v567_v40, %s3661_s30  ;;  %v1305_v63 = vsel %vm771_vm5, %v1273_v29, %v1196_v23  ;;  %3480 = vmatpush3.msra.mxu0 %v3224_v41  ;;  %v2072_v40 = vsel %vm385_vm3, %v3994_v3, %v2071_v5  ;;  %v2248_v29 = vsel %vm562_vm4, %v4005_v12, %v2247_v9 }
  0xbf   : > { %2319 = vrot.lane.b32.xlu0 %v3967_v49, %s3661_s30  ;;  %3402 = vmatprep.mubr.msk.f32.mxu1 %vm1323_vm6, %v1305_v63 }
  0xc0   : > { %v1022_v16 = vpop.permute.xlu1 %1021  ;;  %3481 = vmatprep.subr.mxu0 %v3223_v28 }
  0xc1   : > { %v1274_v7 = vsel %vm214_vm0, %v3928_v17, %v1022_v16  ;;  %v1198_v62 = vpop.permute.xlu0 %1197  ;;  %3482 = vmatpush3.msra.mxu0 %v3223_v28  ;;  %v1975_v28 = vld [vmem:[#allocation2 + $0x70] sm:$0x3] }
  0xc2   : > { %2145 = vrot.lane.b32.xlu1 %v2067_v46, %s3660_s29  ;;  %v1306_v37 = vsel %vm771_vm5, %v1274_v7, %v1198_v62  ;;  %v2076_v25 = vrot.slane %v1975_v28, 1  ;;  %v2252_v7 = vrot.slane %v1975_v28, 2 }
  0xc3   : > { %647 = vrot.lane.b32.xlu0 %v3933_v18, %s3661_s30  ;;  %3403 = vmatmul.mubr.msk.f32.gmra.mxu1 %vm1323_vm6, %v1306_v37 }
  0xc4   : > { %v988_v0 = vpop.permute.xlu1 %987  ;;  %v2077_v37 = vsel %vm385_vm3, %v4049_v50, %v2076_v25  ;;  %v2253_v30 = vsel %vm562_vm4, %v4055_v54, %v2252_v7 }
  0xc5   : > { %v1257_v17 = vsel %vm214_vm0, %v3836_v32, %v988_v0  ;;  %v1164_v10 = vpop.permute.xlu0 %1163  ;;  %v300_v0 = vld [vmem:[#allocation2 + $0x58] sm:$0x3] }
  0xc6   : > { %2321 = vrot.lane.b32.xlu1 %v2243_v38, %s3661_s30  ;;  %v1289_v43 = vsel %vm771_vm5, %v1257_v17, %v1164_v10  ;;  %v404_v10 = vrot.slane %v300_v0, 1 }
  0xc7   : > { %2147 = vrot.lane.b32.xlu0 %v4014_v14, %s3660_s29  ;;  %3378 = vmatprep.mubr.msk.f32.mxu0 %vm1323_vm6, %v1289_v43 }
  0xc8   : > { %v990_v44 = vpop.permute.xlu1 %989 }
  0xc9   : > { %v1258_v18 = vsel %vm214_vm0, %v3845_v35, %v990_v44  ;;  %v1166_v8 = vpop.permute.xlu0 %1165 }
  0xca   : > { %649 = vrot.lane.b32.xlu1 %v3999_v6, %s3661_s30  ;;  %v1290_v32 = vsel %vm771_vm5, %v1258_v18, %v1166_v8  ;;  %v405_v18 = vsel %vm385_vm3, %v3994_v3, %v404_v10  ;;  %v581_v8 = vrot.slane %v300_v0, 2  ;;  %v306_v10 = vld [vmem:[#allocation2 + $0x88] sm:$0x3] }
  0xcb   : > { %2323 = vrot.lane.b32.xlu0 %v4023_v19, %s3661_s30  ;;  %3379 = vmatmul.mubr.msk.f32.gmra.mxu0 %vm1323_vm6, %v1290_v32 }
  0xcc   : > { %v1024_v41 = vpop.permute.xlu1 %1023 }
  0xcd   : > { %v1275_v31 = vsel %vm214_vm0, %v3961_v47, %v1024_v41  ;;  %v1200_v35 = vpop.permute.xlu0 %1199  ;;  %v582_v41 = vsel %vm562_vm4, %v4005_v12, %v581_v8 }
  0xce   : > { %2149 = vrot.lane.b32.xlu1 %v2072_v40, %s3660_s29  ;;  %v1307_v6 = vsel %vm771_vm5, %v1275_v31, %v1200_v35  ;;  %v1978_v40 = vld [vmem:[#allocation2 + $0x88] sm:$0x3] }
  0xcf   : > { %651 = vrot.lane.b32.xlu0 %v3967_v49, %s3661_s30  ;;  %3405 = vmatprep.mubr.msk.f32.mxu1 %vm1323_vm6, %v1307_v6  ;;  %v2081_v3 = vrot.slane %v1978_v40, 1  ;;  %v2257_v35 = vrot.slane %v1978_v40, 2 }
  0xd0   : > { %v1026_v23 = vpop.permute.xlu1 %1025 }
  0xd1   : > { %v1276_v63 = vsel %vm214_vm0, %v3963_v48, %v1026_v23  ;;  %v1202_v46 = vpop.permute.xlu0 %1201  ;;  %v303_v23 = vld [vmem:[#allocation2 + $0x70] sm:$0x3] }
  0xd2   : > { %2325 = vrot.lane.b32.xlu1 %v2248_v29, %s3661_s30  ;;  %v1308_v47 = vsel %vm771_vm5, %v1276_v63, %v1202_v46  ;;  %v2082_v29 = vsel %vm385_vm3, %v4095_v26, %v2081_v3 }
  0xd3   : > { %2151 = vrot.lane.b32.xlu0 %v4060_v55, %s3660_s29  ;;  %3406 = vmatmul.mubr.msk.f32.gmra.mxu1 %vm1323_vm6, %v1308_v47  ;;  %v409_v47 = vrot.slane %v303_v23, 1 }
  0xd4   : > { %v992_v16 = vpop.permute.xlu1 %991 }
  0xd5   : > { %v1259_v49 = vsel %vm214_vm0, %v3984_v60, %v992_v16  ;;  %v1168_v62 = vpop.permute.xlu0 %1167  ;;  %v410_v7 = vsel %vm385_vm3, %v4049_v50, %v409_v47 }
  0xd6   : > { %653 = vrot.lane.b32.xlu1 %v4010_v13, %s3661_s30  ;;  %v1291_v48 = vsel %vm771_vm5, %v1259_v49, %v1168_v62  ;;  %v586_v62 = vrot.slane %v303_v23, 2  ;;  %v5471_v23 = vld [vmem:[#allocation13_spill] sm:$0xff] }
  0xd7   : > { %2327 = vrot.lane.b32.xlu0 %v4069_v59, %s3661_s30  ;;  %3381 = vmatprep.mubr.msk.f32.mxu0 %vm1323_vm6, %v1291_v48 }
  0xd8   : > { %v994_v38 = vpop.permute.xlu1 %993  ;;  %v587_v0 = vsel %vm562_vm4, %v4055_v54, %v586_v62 }
  0xd9   : > { %v1260_v60 = vsel %vm214_vm0, %v3986_v61, %v994_v38  ;;  %v1170_v17 = vpop.permute.xlu0 %1169 }
  0xda   : > { %2153 = vrot.lane.b32.xlu1 %v2077_v37, %s3660_s29  ;;  %v1292_v13 = vsel %vm771_vm5, %v1260_v60, %v1170_v17  ;;  %v1981_v37 = vld [vmem:[#allocation2 + $0xa0] sm:$0x3] }
  0xdb   : > { %2329 = vrot.lane.b32.xlu0 %v2253_v30, %s3661_s30  ;;  %3382 = vmatmul.mubr.msk.f32.gmra.mxu0 %vm1323_vm6, %v1292_v13  ;;  %v2086_v50 = vrot.slane %v1981_v37, 1  ;;  %v2262_v30 = vrot.slane %v1981_v37, 2 }
  0xdc   : > { %v1028_v43 = vpop.permute.xlu1 %1027 }
  0xdd   : > { %v1277_v5 = vsel %vm214_vm0, %v4017_v42, %v1028_v43  ;;  %v1204_v44 = vpop.permute.xlu0 %1203  ;;  %v2087_v13 = vsel %vm385_vm3, %v4141_v27, %v2086_v50 }
  0xde   : > { %478 = vrot.lane.b32.xlu1 %v4014_v14, %s3660_s29  ;;  %v1309_v61 = vsel %vm771_vm5, %v1277_v5, %v1204_v44 }
  0xdf   : > { %655 = vrot.lane.b32.xlu0 %v4023_v19, %s3661_s30  ;;  %3408 = vmatprep.mubr.msk.f32.mxu1 %vm1323_vm6, %v1309_v61  ;;  %v414_v61 = vrot.slane %v306_v10, 1 }
  0xe0   : > { %v1030_v32 = vpop.permute.xlu1 %1029 }
  0xe1   : > { %v1278_v42 = vsel %vm214_vm0, %v4019_v15, %v1030_v32  ;;  %v1206_v9 = vpop.permute.xlu0 %1205  ;;  %v415_v40 = vsel %vm385_vm3, %v4095_v26, %v414_v61  ;;  %v5478_v61 = vld [vmem:[#allocation12_spill] sm:$0xff] }
  0xe2   : > { %480 = vrot.lane.b32.xlu1 %v405_v18, %s3660_s29  ;;  %v1310_v14 = vsel %vm771_vm5, %v1278_v42, %v1206_v9  ;;  %v591_v42 = vrot.slane %v306_v10, 2 }
  0xe3   : > { %2155 = vrot.lane.b32.xlu0 %v4106_v39, %s3660_s29  ;;  %3409 = vmatmul.mubr.msk.f32.gmra.mxu1 %vm1323_vm6, %v1310_v14  ;;  %v1984_v14 = vld [vmem:[#allocation2 + $0xb8] sm:$0x3] }
  0xe4   : > { %v996_v19 = vpop.permute.xlu1 %995  ;;  %v2091_v26 = vrot.slane %v1984_v14, 1 }
  0xe5   : > { %v1261_v31 = vsel %vm214_vm0, %v4040_v33, %v996_v19  ;;  %v1172_v15 = vpop.permute.xlu0 %1171  ;;  %v2258_v33 = vsel %vm562_vm4, %v4101_v36, %v2257_v35  ;;  %v592_v19 = vsel %vm562_vm4, %v4101_v36, %v591_v42  ;;  %v5470_v35 = vld [vmem:[#allocation7_spill] sm:$0xff] }
  0xe6   : > { %657 = vrot.lane.b32.xlu1 %v582_v41, %s3661_s30  ;;  %v1293_v6 = vsel %vm771_vm5, %v1261_v31, %v1172_v15  ;;  %v5468_v41 = vld [vmem:[#allocation6_spill] sm:$0xff]  ;;  %v5469_v31 = vld [vmem:[#allocation16_spill] sm:$0xff]  ;;  %v5472_v36 = vld [vmem:[#allocation19_spill] sm:$0xff] }
  0xe7   : > { %2331 = vrot.lane.b32.xlu0 %v4115_v52, %s3661_s30  ;;  %3384 = vmatprep.mubr.msk.f32.mxu0 %vm1323_vm6, %v1293_v6  ;;  %v2267_v6 = vrot.slane %v1984_v14, 2 }
  0xe8   : > { %v998_v12 = vpop.permute.xlu1 %997 }
  0xe9   : > { %v1262_v28 = vsel %vm214_vm0, %v4042_v34, %v998_v12  ;;  %v1174_v63 = vpop.permute.xlu0 %1173 }
  0xea   : > { %2157 = vrot.lane.b32.xlu1 %v2082_v29, %s3660_s29  ;;  %v1294_v46 = vsel %vm771_vm5, %v1262_v28, %v1174_v63  ;;  %v2092_v28 = vsel %vm385_vm3, %v5471_v23, %v2091_v26  ;;  %v309_v63 = vld [vmem:[#allocation2 + $0xa0] sm:$0x3] }
  0xeb   : > { %2333 = vrot.lane.b32.xlu0 %v2258_v33, %s3661_s30  ;;  %3385 = vmatmul.mubr.msk.f32.gmra.mxu0 %vm1323_vm6, %v1294_v46  ;;  %v5473_v46 = vld [vmem:[#allocation8_spill] sm:$0xff] }
  0xec   : > { %v1032_v25 = vpop.permute.xlu1 %1031 }
  0xed   : > { %v1279_v16 = vsel %vm214_vm0, %v4063_v57, %v1032_v25  ;;  %v1208_v49 = vpop.permute.xlu0 %1207  ;;  %v5474_v25 = vld [vmem:[#allocation14_spill] sm:$0xff] }
  0xee   : > { %482 = vrot.lane.b32.xlu1 %v4060_v55, %s3660_s29  ;;  %v1311_v34 = vsel %vm771_vm5, %v1279_v16, %v1208_v49  ;;  %v2268_v16 = vsel %vm562_vm4, %v5474_v25, %v2267_v6  ;;  %v1990_v6 = vld [vmem:[#allocation2 + $0xe8] sm:$0x3] }
  0xef   : > { %659 = vrot.lane.b32.xlu0 %v4069_v59, %s3661_s30  ;;  %3411 = vmatprep.mubr.msk.f32.mxu1 %vm1323_vm6, %v1311_v34 }
  0xf0   : > { %v1034_v48 = vpop.permute.xlu1 %1033 }
  0xf1   : > { %v1280_v57 = vsel %vm214_vm0, %v4065_v58, %v1034_v48  ;;  %v1210_v38 = vpop.permute.xlu0 %1209  ;;  %v5475_v48 = vld [vmem:[#allocation9_spill] sm:$0xff] }
  0xf2   : > { %484 = vrot.lane.b32.xlu1 %v410_v7, %s3660_s29  ;;  %v1312_v55 = vsel %vm771_vm5, %v1280_v57, %v1210_v38  ;;  %v419_v7 = vrot.slane %v309_v63, 1 }
  0xf3   : > { %2159 = vrot.lane.b32.xlu0 %v4152_v56, %s3660_s29  ;;  %3412 = vmatmul.mubr.msk.f32.gmra.mxu1 %vm1323_vm6, %v1312_v55 }
  0xf4   : > { %v1000_v59 = vpop.permute.xlu1 %999  ;;  %v420_v55 = vsel %vm385_vm3, %v4141_v27, %v419_v7 }
  0xf5   : > { %v1263_v60 = vsel %vm214_vm0, %v4086_v20, %v1000_v59  ;;  %v1176_v58 = vpop.permute.xlu0 %1175  ;;  %v2263_v20 = vsel %vm562_vm4, %v4147_v53, %v2262_v30  ;;  %v1987_v59 = vld [vmem:[#allocation2 + $0xd0] sm:$0x3] }
  0xf6   : > { %661 = vrot.lane.b32.xlu1 %v587_v0, %s3661_s30  ;;  %v1295_v17 = vsel %vm771_vm5, %v1263_v60, %v1176_v58  ;;  %v596_v0 = vrot.slane %v309_v63, 2  ;;  %v5476_v60 = vld [vmem:[#allocation10_spill] sm:$0xff]  ;;  %v2096_v27 = vrot.slane %v1987_v59, 1  ;;  %v2272_v10 = vrot.slane %v1987_v59, 2 }
  0xf7   : > { %2335 = vrot.lane.b32.xlu0 %v4161_v1, %s3661_s30  ;;  %3387 = vmatprep.mubr.msk.f32.mxu0 %vm1323_vm6, %v1295_v17  ;;  %v4583_v59 = vld [vmem:[#allocation2 + $0xf8] sm:$0xff] }
  0xf8   : > { %v1002_v54 = vpop.permute.xlu1 %1001  ;;  %v597_v17 = vsel %vm562_vm4, %v4147_v53, %v596_v0 }
  0xf9   : > { %v1264_v43 = vsel %vm214_vm0, %v4088_v21, %v1002_v54  ;;  %v1178_v5 = vpop.permute.xlu0 %1177 }
  0xfa   : > { %2161 = vrot.lane.b32.xlu1 %v2087_v13, %s3660_s29  ;;  %v1296_v44 = vsel %vm771_vm5, %v1264_v43, %v1178_v5  ;;  %v5477_v13 = vld [vmem:[#allocation11_spill] sm:$0xff]  ;;  %v2097_v5 = vsel %vm385_vm3, %v4243_v2, %v2096_v27 }
  0xfb   : > { %2337 = vrot.lane.b32.xlu0 %v2263_v20, %s3661_s30  ;;  %3388 = vmatmul.mubr.msk.f32.gmra.mxu0 %vm1323_vm6, %v1296_v44  ;;  %v312_v44 = vld [vmem:[#allocation2 + $0xb8] sm:$0x3] }
  0xfc   : > { %v1036_v18 = vpop.permute.xlu1 %1035 }
  0xfd   : > { %v1281_v8 = vsel %vm214_vm0, %v4109_v45, %v1036_v18  ;;  %v1212_v32 = vpop.permute.xlu0 %1211 }
  0xfe   : > { %486 = vrot.lane.b32.xlu1 %v4106_v39, %s3660_s29  ;;  %v1313_v21 = vsel %vm771_vm5, %v1281_v8, %v1212_v32  ;;  %v2273_v8 = vsel %vm562_vm4, %v4256_v24, %v2272_v10  ;;  %v3580_v10 = vld [vmem:[#allocation2 + $0x8] sm:$0xff] }
  0xff   : > { %663 = vrot.lane.b32.xlu0 %v4115_v52, %s3661_s30  ;;  %3414 = vmatprep.mubr.msk.f32.mxu1 %vm1323_vm6, %v1313_v21  ;;  %v4525_v21 = vld [vmem:[#allocation2 + $0xd8] sm:$0xff] }
 0x100   : > { %v1038_v9 = vpop.permute.xlu1 %1037 }
 0x101   : > { %v1282_v45 = vsel %vm214_vm0, %v5468_v41, %v1038_v9  ;;  %v1214_v3 = vpop.permute.xlu0 %1213  ;;  %v424_v9 = vrot.slane %v312_v44, 1  ;;  %v5479_v41 = vld [vmem:[#allocation17_spill] sm:$0xff] }
 0x102   : > { %488 = vrot.lane.b32.xlu1 %v415_v40, %s3660_s29  ;;  %v1314_v39 = vsel %vm771_vm5, %v1282_v45, %v1214_v3  ;;  %v4527_v40 = vld [vmem:[#allocation2 + $0xe0] sm:$0xff]  ;;  %v2098_v3 = vrot.slane %v4525_v21, 1 }
 0x103   : > { %2163 = vrot.lane.b32.xlu0 %v5469_v31, %s3660_s29  ;;  %3415 = vmatmul.mubr.msk.f32.gmra.mxu1 %vm1323_vm6, %v1314_v39  ;;  %v4536_v39 = vrot.slane %v4527_v40, 1 }
 0x104   : > { %v1004_v52 = vpop.permute.xlu1 %1003 }
 0x105   : > { %v1265_v15 = vsel %vm214_vm0, %v5470_v35, %v1004_v52  ;;  %v1180_v29 = vpop.permute.xlu0 %1179  ;;  %v425_v52 = vsel %vm385_vm3, %v5471_v23, %v424_v9  ;;  %v601_v35 = vrot.slane %v312_v44, 2 }
 0x106   : > { %665 = vrot.lane.b32.xlu1 %v592_v19, %s3661_s30  ;;  %v1297_v12 = vsel %vm771_vm5, %v1265_v15, %v1180_v29  ;;  %v5480_v29 = vld [vmem:[#allocation18_spill] sm:$0xff] }
 0x107   : > { %2339 = vrot.lane.b32.xlu0 %v5472_v36, %s3661_s30  ;;  %3390 = vmatprep.mubr.msk.f32.mxu0 %vm1323_vm6, %v1297_v12  ;;  %v602_v63 = vsel %vm562_vm4, %v5474_v25, %v601_v35 }
 0x108   : > { %v1006_v33 = vpop.permute.xlu1 %1005 }
 0x109   : > { %v1266_v47 = vsel %vm214_vm0, %v5473_v46, %v1006_v33  ;;  %v1182_v49 = vpop.permute.xlu0 %1181  ;;  %v4554_v33 = vrot.slane %v4527_v40, 2  ;;  %v2101_v46 = vrot.slane %v1990_v6, 1 }
 0x10a   : > { %2165 = vrot.lane.b32.xlu1 %v2092_v28, %s3660_s29  ;;  %v1298_v34 = vsel %vm771_vm5, %v1266_v47, %v1182_v49  ;;  %v4550_v28 = vsel %vm385_vm3, %v2098_v3, %v4536_v39  ;;  %v3582_v3 = vld [vmem:[#allocation2 + $0x18] sm:$0xff] }
 0x10b   : > { %2341 = vrot.lane.b32.xlu0 %v2268_v16, %s3661_s30  ;;  %3391 = vmatmul.mubr.msk.f32.gmra.mxu0 %vm1323_vm6, %v1298_v34  ;;  %v2277_v34 = vrot.slane %v1990_v6, 2 }
 0x10c   : > { %v1040_v62 = vpop.permute.xlu1 %1039 }
 0x10d   : > { %v1283_v37 = vsel %vm214_vm0, %v5475_v48, %v1040_v62  ;;  %v1216_v57 = vpop.permute.xlu0 %1215  ;;  %v2102_v62 = vsel %vm385_vm3, %v4536_v39, %v2101_v46  ;;  %v4646_v46 = vld [vmem:[#allocation2 + $0x110] sm:$0xff] }
 0x10e   : > { %490 = vrot.lane.b32.xlu1 %v4152_v56, %s3660_s29  ;;  %v1315_v38 = vsel %vm771_vm5, %v1283_v37, %v1216_v57  ;;  %v2278_v37 = vsel %vm562_vm4, %v4554_v33, %v2277_v34  ;;  %v3579_v57 = vld [vmem:[#allocation2] sm:$0xff] }
 0x10f   : > { %667 = vrot.lane.b32.xlu0 %v4161_v1, %s3661_s30  ;;  %3417 = vmatprep.mubr.msk.f32.mxu1 %vm1323_vm6, %v1315_v38  ;;  %v5481_v38 = vld [vmem:[#allocation15_spill] sm:$0xff] }
 0x110   : > { %v1042_v50 = vpop.permute.xlu1 %1041  ;;  %v5484_v34 = vld [vmem:[#allocation23_spill] sm:$0xff] }
 0x111   : > { %v1284_v30 = vsel %vm214_vm0, %v5476_v60, %v1042_v50  ;;  %v1218_v58 = vpop.permute.xlu0 %1217  ;;  %v4581_v50 = vld [vmem:[#allocation2 + $0xf0] sm:$0xff] }
 0x112   : > { %492 = vrot.lane.b32.xlu1 %v420_v55, %s3660_s29  ;;  %v1316_v56 = vsel %vm771_vm5, %v1284_v30, %v1218_v58  ;;  %v739_v55 = vsel %vm214_vm0, %v3579_v57, %v5481_v38  ;;  %v2103_v27 = vrot.slane %v4581_v50, 1  ;;  %v4658_v57 = vrot.slane %v4646_v46, 1 }
 0x113   : > { %2167 = vrot.lane.b32.xlu0 %v4262_v51, %s3660_s29  ;;  %3418 = vmatmul.mubr.msk.f32.gmra.mxu1 %vm1323_vm6, %v1316_v56 }
 0x114   : > { %v1008_v1 = vpop.permute.xlu1 %1007 }
 0x115   : > { %v1267_v54 = vsel %vm214_vm0, %v5477_v13, %v1008_v1  ;;  %v1184_v43 = vpop.permute.xlu0 %1183  ;;  %v4593_v1 = vrot.slane %v4583_v59, 1 }
 0x116   : > { %669 = vrot.lane.b32.xlu1 %v597_v17, %s3661_s30  ;;  %v1299_v20 = vsel %vm771_vm5, %v1267_v54, %v1184_v43  ;;  %v5482_v43 = vld [vmem:[#allocation20_spill] sm:$0xff] }
 0x117   : > { %2343 = vrot.lane.b32.xlu0 %v4270_v4, %s3661_s30  ;;  %3393 = vmatprep.mubr.msk.f32.mxu0 %vm1323_vm6, %v1299_v20  ;;  %v740_v20 = vsel %vm214_vm0, %v3580_v10, %v5482_v43  ;;  %v3586_v10 = vld [vmem:[#allocation2 + $0x50] sm:$0xff] }
 0x118   : > { %v1010_v53 = vpop.permute.xlu1 %1009 }
 0x119   : > { %v1268_v18 = vsel %vm214_vm0, %v5478_v61, %v1010_v53  ;;  %v1186_v32 = vpop.permute.xlu0 %1185 }
 0x11a   : > { %2169 = vrot.lane.b32.xlu1 %v2097_v5, %s3660_s29  ;;  %v1300_v42 = vsel %vm771_vm5, %v1268_v18, %v1186_v32  ;;  %v4602_v5 = vld [vmem:[#allocation2 + $0x30] sm:$0xff]  ;;  %v2279_v18 = vrot.slane %v4581_v50, 2 }
 0x11b   : > { %2345 = vrot.lane.b32.xlu0 %v2273_v8, %s3661_s30  ;;  %3394 = vmatmul.mubr.msk.f32.gmra.mxu0 %vm1323_vm6, %v1300_v42  ;;  %v4615_v8 = vrot.slane %v4583_v59, 2 }
 0x11c   : > { %v1044_v14 = vpop.permute.xlu1 %1043 }
 0x11d   : > { %v1285_v45 = vsel %vm214_vm0, %v5479_v41, %v1044_v14  ;;  %v1220_v19 = vpop.permute.xlu0 %1219  ;;  %v4627_v41 = vsel %vm562_vm4, %v2279_v18, %v4615_v8 }
 0x11e   : > { %494 = vrot.lane.b32.xlu1 %v5469_v31, %s3660_s29  ;;  %v1317_v26 = vsel %vm771_vm5, %v1285_v45, %v1220_v19  ;;  %v2274_v31 = vrot.slane %v4525_v21, 2  ;;  %v5483_v19 = vld [vmem:[#allocation21_spill] sm:$0xff] }
 0x11f   : > { %671 = vrot.lane.b32.xlu0 %v5472_v36, %s3661_s30  ;;  %3420 = vmatprep.mubr.msk.f32.mxu1 %vm1323_vm6, %v1317_v26  ;;  %v741_v26 = vsel %vm214_vm0, %v3582_v3, %v5483_v19  ;;  %v4710_v19 = vld [vmem:[#allocation2 + $0x120] sm:$0xff] }
 0x120   : > { %v1046_v15 = vpop.permute.xlu1 %1045  ;;  %v4567_v49 = vsel %vm562_vm4, %v2274_v31, %v4554_v33 }
 0x121   : > { %v1286_v12 = vsel %vm214_vm0, %v5480_v29, %v1046_v15  ;;  %v1222_v23 = vpop.permute.xlu0 %1221  ;;  %v3583_v15 = vld [vmem:[#allocation2 + $0x38] sm:$0xff] }
 0x122   : > { %496 = vrot.lane.b32.xlu1 %v425_v52, %s3660_s29  ;;  %v1318_v36 = vsel %vm771_vm5, %v1286_v12, %v1222_v23  ;;  %v318_v12 = vld [vmem:[#allocation2 + $0xe8] sm:$0x3] }
 0x123   : > { %2171 = vrot.lane.b32.xlu0 %v4550_v28, %s3660_s29  ;;  %3421 = vmatmul.mubr.msk.f32.gmra.mxu1 %vm1323_vm6, %v1318_v36 }
 0x124   : > { %v1012_v47 = vpop.permute.xlu1 %1011 }
 0x125   : > { %v1269_v16 = vsel %vm214_vm0, %v4234_v22, %v1012_v47  ;;  %v1188_v7 = vpop.permute.xlu0 %1187  ;;  %v315_v22 = vld [vmem:[#allocation2 + $0xd0] sm:$0x3]  ;;  %v434_v47 = vrot.slane %v318_v12, 1 }
 0x126   : > { %673 = vrot.lane.b32.xlu1 %v602_v63, %s3661_s30  ;;  %v1301_v25 = vsel %vm771_vm5, %v1269_v16, %v1188_v7  ;;  %v429_v30 = vrot.slane %v315_v22, 1  ;;  %v606_v54 = vrot.slane %v315_v22, 2  ;;  %v4644_v63 = vld [vmem:[#allocation2 + $0x108] sm:$0xff]  ;;  %v3584_v16 = vld [vmem:[#allocation2 + $0x20] sm:$0xff] }
 0x127   : > { %2347 = vrot.lane.b32.xlu0 %v4567_v49, %s3661_s30  ;;  %3396 = vmatprep.mubr.msk.f32.mxu0 %vm1323_vm6, %v1301_v25  ;;  %v742_v7 = vsel %vm214_vm0, %v3584_v16, %v5484_v34  ;;  %v4650_v25 = vld [vmem:[#allocation2 + $0x48] sm:$0xff]  ;;  %v1999_v34 = vld [vmem:[#allocation2 + $0x130] sm:$0x3] }
 0x128   : > { %v1014_v48 = vpop.permute.xlu1 %1013  ;;  %v607_v42 = vsel %vm562_vm4, %v4256_v24, %v606_v54 }
 0x129   : > { %v644_v0 = vpop.permute.xlu0 %643  ;;  %v1270_v58 = vsel %vm214_vm0, %v4236_v11, %v1014_v48  ;;  %v430_v11 = vsel %vm385_vm3, %v4243_v2, %v429_v30  ;;  %v4611_v2 = vsel %vm385_vm3, %v2103_v27, %v4593_v1  ;;  %v5485_v27 = vld [vmem:[#allocation22_spill] sm:$0xff] }
 0x12a   : > { %2173 = vrot.lane.b32.xlu1 %v2102_v62, %s3660_s29  ;;  %v772_v60 = vsel %vm771_vm5, %v739_v55, %v644_v0  ;;  %v435_v0 = vsel %vm385_vm3, %v4536_v39, %v434_v47  ;;  %v743_v39 = vsel %vm214_vm0, %v4602_v5, %v5485_v27  ;;  %v324_v27 = vld [vmem:[#allocation2 + $0x118] sm:$0x3] }
 0x12b   : > { %2349 = vrot.lane.b32.xlu0 %v2278_v37, %s3661_s30  ;;  %3429 = vmatprep.mubr.msk.f32.mxu1 %vm1323_vm6, %v772_v60  ;;  %v2108_v37 = vrot.slane %v4644_v63, 1  ;;  %v611_v60 = vrot.slane %v318_v12, 2 }
 0x12c   : > { %v1190_v56 = vpop.permute.xlu1 %1189 }
 0x12d   : > { %v1302_v17 = vsel %vm771_vm5, %v1270_v58, %v1190_v56  ;;  %v2144_v13 = vpop.permute.xlu0 %2143  ;;  %v1996_v58 = vld [vmem:[#allocation2 + $0x118] sm:$0x3]  ;;  %v4671_v56 = vsel %vm385_vm3, %v2108_v37, %v4658_v57  ;;  %v2116_v37 = vrot.slane %v1999_v34, 1 }
 0x12e   : > { %498 = vrot.lane.b32.xlu1 %v4262_v51, %s3660_s29  ;;  %3397 = vmatmul.mubr.msk.f32.gmra.mxu0 %vm1323_vm6, %v1302_v17  ;;  %v2415_v53 = vsel %vm214_vm0, %v4602_v5, %v2144_v13  ;;  %v1993_v51 = vld [vmem:[#allocation2 + $0x100] sm:$0x3]  ;;  %v4675_v17 = vrot.slane %v4646_v46, 2  ;;  %v2111_v54 = vrot.slane %v1996_v58, 1 }
 0x12f   : > { %675 = vrot.lane.b32.xlu0 %v4270_v4, %s3661_s30  ;;  %v2106_v9 = vrot.slane %v1993_v51, 1  ;;  %v2282_v45 = vrot.slane %v1993_v51, 2 }
 0x130   : > { %v646_v44 = vpop.permute.xlu1 %645 }
 0x131   : > { %v773_v61 = vsel %vm771_vm5, %v740_v20, %v646_v44  ;;  %v2320_v32 = vpop.permute.xlu0 %2319  ;;  %v2107_v35 = vsel %vm385_vm3, %v4593_v1, %v2106_v9  ;;  %v2283_v23 = vsel %vm562_vm4, %v4615_v8, %v2282_v45  ;;  %v2287_v44 = vrot.slane %v1996_v58, 2  ;;  %v321_v9 = vld [vmem:[#allocation2 + $0x100] sm:$0x3] }
 0x132   : > { %500 = vrot.lane.b32.xlu1 %v430_v11, %s3660_s29  ;;  %3430 = vmatmul.mubr.msk.f32.vlgmr.msra.gmra.mxu1 %vm1323_vm6, %v773_v61  ;;  %v2447_v4 = vsel %vm771_vm5, %v2415_v53, %v2320_v32  ;;  %v612_v11 = vsel %vm562_vm4, %v4554_v33, %v611_v60  ;;  %v2112_v33 = vsel %vm385_vm3, %v4658_v57, %v2111_v54  ;;  %v5486_v61 = vld [vmem:[#allocation24_spill] sm:$0xff]  ;;  %v616_v47 = vrot.slane %v321_v9, 2 }
 0x133   : > { %2175 = vrot.lane.b32.xlu0 %v4611_v2, %s3660_s29  ;;  %3483 = vmatprep.mubr.msk.f32.mxu0 %vm1323_vm6, %v2447_v4  ;;  %v744_v18 = vsel %vm214_vm0, %v3583_v15, %v5486_v61  ;;  %v4699_v32 = vld [vmem:[#allocation2 + $0x60] sm:$0xff]  ;;  %v2288_v45 = vsel %vm562_vm4, %v4675_v17, %v2287_v44 }
 0x134   : > { %v2146_v14 = vpop.permute.xlu1 %2145  ;;  %v4771_v54 = vld [vmem:[#allocation2 + $0x140] sm:$0xff] }
 0x135   : > { %v648_v52 = vpop.permute.xlu0 %647  ;;  %v2416_v6 = vsel %vm214_vm0, %v3583_v15, %v2146_v14  ;;  %v4717_v15 = vld [vmem:[#allocation2 + $0x68] sm:$0xff] }
 0x136   : > { %677 = vrot.lane.b32.xlu1 %v607_v42, %s3661_s30  ;;  %v774_v24 = vsel %vm771_vm5, %v741_v26, %v648_v52  ;;  %v4712_v26 = vld [vmem:[#allocation2 + $0x128] sm:$0xff] }
 0x137   : > { %2351 = vrot.lane.b32.xlu0 %v4627_v41, %s3661_s30  ;;  %3432 = vmatprep.mubr.msk.f32.mxu1 %vm1323_vm6, %v774_v24  ;;  %v439_v24 = vrot.slane %v321_v9, 1  ;;  %v4723_v12 = vrot.slane %v4712_v26, 1 }
 0x138   : > { %v2322_v29 = vpop.permute.xlu1 %2321 }
 0x139   : > { %v2448_v31 = vsel %vm771_vm5, %v2416_v6, %v2322_v29  ;;  %v2148_v36 = vpop.permute.xlu0 %2147  ;;  %v2113_v29 = vrot.slane %v4710_v19, 1  ;;  %v2117_v60 = vsel %vm385_vm3, %v4723_v12, %v2116_v37 }
 0x13a   : > { %2177 = vrot.lane.b32.xlu1 %v2107_v35, %s3660_s29  ;;  %3484 = vmatmul.mubr.msk.f32.vlgmr.msra.gmra.mxu0 %vm1323_vm6, %v2448_v31  ;;  %v2417_v62 = vsel %vm214_vm0, %v4650_v25, %v2148_v36  ;;  %v440_v36 = vsel %vm385_vm3, %v4593_v1, %v439_v24 }
 0x13b   : > { %2353 = vrot.lane.b32.xlu0 %v2283_v23, %s3661_s30 }
 0x13c   : > { %v650_v48 = vpop.permute.xlu1 %649 }
 0x13d   : > { %v775_v22 = vsel %vm771_vm5, %v742_v7, %v650_v48  ;;  %v2324_v38 = vpop.permute.xlu0 %2323  ;;  %v4741_v48 = vrot.slane %v4712_v26, 2 }
 0x13e   : > { %502 = vrot.lane.b32.xlu1 %v4550_v28, %s3660_s29  ;;  %3433 = vmatmul.mubr.msk.f32.gmra.mxu1 %vm1323_vm6, %v775_v22  ;;  %v2449_v55 = vsel %vm771_vm5, %v2417_v62, %v2324_v38  ;;  %v2284_v28 = vrot.slane %v4644_v63, 2  ;;  %v4737_v62 = vsel %vm385_vm3, %v2113_v29, %v4723_v12  ;;  %v617_v22 = vsel %vm562_vm4, %v4615_v8, %v616_v47 }
 0x13f   : > { %679 = vrot.lane.b32.xlu0 %v4567_v49, %s3661_s30  ;;  %3486 = vmatprep.mubr.msk.f32.mxu0 %vm1323_vm6, %v2449_v55  ;;  %v2292_v55 = vrot.slane %v1999_v34, 2  ;;  %v327_v34 = vld [vmem:[#allocation2 + $0x130] sm:$0x3] }
 0x140   : > { %v2150_v30 = vpop.permute.xlu1 %2149  ;;  %v4691_v53 = vsel %vm562_vm4, %v2284_v28, %v4675_v17  ;;  %v449_v37 = vrot.slane %v327_v34, 1 }
 0x141   : > { %v652_v13 = vpop.permute.xlu0 %651  ;;  %v2418_v43 = vsel %vm214_vm0, %v3586_v10, %v2150_v30  ;;  %v4758_v30 = vld [vmem:[#allocation2 + $0x78] sm:$0xff] }
 0x142   : > { %504 = vrot.lane.b32.xlu1 %v435_v0, %s3660_s29  ;;  %v776_v49 = vsel %vm771_vm5, %v743_v39, %v652_v13  ;;  %v2293_v13 = vsel %vm562_vm4, %v4741_v48, %v2292_v55  ;;  %v4836_v55 = vld [vmem:[#allocation2 + $0x98] sm:$0xff] }
 0x143   : > { %2179 = vrot.lane.b32.xlu0 %v4671_v56, %s3660_s29  ;;  %3435 = vmatprep.mubr.msk.f32.mxu1 %vm1323_vm6, %v776_v49 }
 0x144   : > { %v2326_v20 = vpop.permute.xlu1 %2325 }
 0x145   : > { %v2450_v5 = vsel %vm771_vm5, %v2418_v43, %v2326_v20  ;;  %v2152_v51 = vpop.permute.xlu0 %2151  ;;  %v444_v43 = vrot.slane %v324_v27, 1 }
 0x146   : > { %681 = vrot.lane.b32.xlu1 %v612_v11, %s3661_s30  ;;  %3487 = vmatmul.mubr.msk.f32.gmra.mxu0 %vm1323_vm6, %v2450_v5  ;;  %v2419_v4 = vsel %vm214_vm0, %v4699_v32, %v2152_v51  ;;  %v4769_v11 = vld [vmem:[#allocation2 + $0x138] sm:$0xff]  ;;  %v4776_v5 = vld [vmem:[#allocation2 + $0x80] sm:$0xff] }
 0x147   : > { %2355 = vrot.lane.b32.xlu0 %v4691_v53, %s3661_s30  ;;  %v2118_v51 = vrot.slane %v4769_v11, 1 }
 0x148   : > { %v654_v42 = vpop.permute.xlu1 %653 }
 0x149   : > { %v777_v14 = vsel %vm771_vm5, %v744_v18, %v654_v42  ;;  %v2328_v3 = vpop.permute.xlu0 %2327  ;;  %v621_v42 = vrot.slane %v324_v27, 2  ;;  %v450_v27 = vsel %vm385_vm3, %v4723_v12, %v449_v37  ;;  %v2008_v37 = vld [vmem:[#allocation2 + $0x178] sm:$0x3] }
 0x14a   : > { %2181 = vrot.lane.b32.xlu1 %v2112_v33, %s3660_s29  ;;  %3436 = vmatmul.mubr.msk.f32.gmra.mxu1 %vm1323_vm6, %v777_v14  ;;  %v2451_v52 = vsel %vm771_vm5, %v2419_v4, %v2328_v3  ;;  %v4782_v33 = vrot.slane %v4771_v54, 1  ;;  %v445_v4 = vsel %vm385_vm3, %v4658_v57, %v444_v43  ;;  %v2002_v14 = vld [vmem:[#allocation2 + $0x148] sm:$0x3] }
 0x14b   : > { %2357 = vrot.lane.b32.xlu0 %v2288_v45, %s3661_s30  ;;  %3489 = vmatprep.mubr.msk.f32.mxu0 %vm1323_vm6, %v2451_v52  ;;  %v4800_v52 = vrot.slane %v4771_v54, 2  ;;  %v622_v24 = vsel %vm562_vm4, %v4675_v17, %v621_v42  ;;  %v2297_v29 = vrot.slane %v2002_v14, 2 }
 0x14c   : > { %v2154_v35 = vpop.permute.xlu1 %2153  ;;  %v4796_v3 = vsel %vm385_vm3, %v2118_v51, %v4782_v33 }
 0x14d   : > { %v2420_v6 = vsel %vm214_vm0, %v4717_v15, %v2154_v35  ;;  %v2330_v31 = vpop.permute.xlu0 %2329  ;;  %v2121_v35 = vrot.slane %v2002_v14, 1 }
 0x14e   : > { %506 = vrot.lane.b32.xlu1 %v4611_v2, %s3660_s29  ;;  %v2452_v23 = vsel %vm771_vm5, %v2420_v6, %v2330_v31  ;;  %v2289_v2 = vrot.slane %v4710_v19, 2 }
 0x14f   : > { %683 = vrot.lane.b32.xlu0 %v4627_v41, %s3661_s30  ;;  %3490 = vmatmul.mubr.msk.f32.gmra.mxu0 %vm1323_vm6, %v2452_v23  ;;  %v2122_v23 = vsel %vm385_vm3, %v4782_v33, %v2121_v35  ;;  %v4891_v35 = vld [vmem:[#allocation2 + $0x170] sm:$0xff] }
 0x150   : > { %v479_v16 = vpop.permute.xlu1 %478  ;;  %v4752_v38 = vsel %vm562_vm4, %v2289_v2, %v4741_v48  ;;  %v2298_v2 = vsel %vm562_vm4, %v4800_v52, %v2297_v29 }
 0x151   : > { %v745_v7 = vsel %vm214_vm0, %v4650_v25, %v479_v16  ;;  %v656_v1 = vpop.permute.xlu0 %655 }
 0x152   : > { %508 = vrot.lane.b32.xlu1 %v440_v36, %s3660_s29  ;;  %v778_v41 = vsel %vm771_vm5, %v745_v7, %v656_v1  ;;  %v4818_v36 = vld [vmem:[#allocation2 + $0x90] sm:$0xff] }
 0x153   : > { %2183 = vrot.lane.b32.xlu0 %v4737_v62, %s3660_s29  ;;  %3438 = vmatprep.mubr.msk.f32.mxu1 %vm1323_vm6, %v778_v41  ;;  %v4831_v41 = vld [vmem:[#allocation2 + $0x158] sm:$0xff] }
 0x154   : > { %v481_v25 = vpop.permute.xlu1 %480 }
 0x155   : > { %v2156_v0 = vpop.permute.xlu0 %2155  ;;  %v746_v8 = vsel %vm214_vm0, %v3586_v10, %v481_v25 }
 0x156   : > { %685 = vrot.lane.b32.xlu1 %v617_v22, %s3661_s30  ;;  %v2421_v58 = vsel %vm214_vm0, %v4758_v30, %v2156_v0 }
 0x157   : > { %2359 = vrot.lane.b32.xlu0 %v4752_v38, %s3661_s30 }
 0x158   : > { %v658_v28 = vpop.permute.xlu1 %657 }
 0x159   : > { %v779_v39 = vsel %vm771_vm5, %v746_v8, %v658_v28  ;;  %v2332_v49 = vpop.permute.xlu0 %2331  ;;  %v4842_v8 = vrot.slane %v4831_v41, 1 }
 0x15a   : > { %2185 = vrot.lane.b32.xlu1 %v2117_v60, %s3660_s29  ;;  %3439 = vmatmul.mubr.msk.f32.gmra.mxu1 %vm1323_vm6, %v779_v39  ;;  %v2453_v10 = vsel %vm771_vm5, %v2421_v58, %v2332_v49  ;;  %v626_v39 = vrot.slane %v327_v34, 2  ;;  %v2005_v49 = vld [vmem:[#allocation2 + $0x160] sm:$0x3] }
 0x15b   : > { %2361 = vrot.lane.b32.xlu0 %v2293_v13, %s3661_s30  ;;  %3492 = vmatprep.mubr.msk.f32.mxu0 %vm1323_vm6, %v2453_v10  ;;  %v2126_v51 = vrot.slane %v2005_v49, 1 }
 0x15c   : > { %v2158_v20 = vpop.permute.xlu1 %2157 }
 0x15d   : > { %v2422_v44 = vsel %vm214_vm0, %v4776_v5, %v2158_v20  ;;  %v2334_v61 = vpop.permute.xlu0 %2333  ;;  %v4860_v20 = vrot.slane %v4831_v41, 2  ;;  %v2127_v42 = vsel %vm385_vm3, %v4842_v8, %v2126_v51 }
 0x15e   : > { %510 = vrot.lane.b32.xlu1 %v4671_v56, %s3660_s29  ;;  %v2454_v18 = vsel %vm771_vm5, %v2422_v44, %v2334_v61  ;;  %v2294_v56 = vrot.slane %v4769_v11, 2  ;;  %v627_v44 = vsel %vm562_vm4, %v4741_v48, %v626_v39  ;;  %v2307_v39 = vrot.slane %v2008_v37, 2 }
 0x15f   : > { %687 = vrot.lane.b32.xlu0 %v4691_v53, %s3661_s30  ;;  %3493 = vmatmul.mubr.msk.f32.gmra.mxu0 %vm1323_vm6, %v2454_v18  ;;  %v2302_v18 = vrot.slane %v2005_v49, 2 }
 0x160   : > { %v483_v9 = vpop.permute.xlu1 %482  ;;  %v4811_v6 = vsel %vm562_vm4, %v2294_v56, %v4800_v52  ;;  %v330_v56 = vld [vmem:[#allocation2 + $0x148] sm:$0x3] }
 0x161   : > { %v747_v45 = vsel %vm214_vm0, %v4699_v32, %v483_v9  ;;  %v660_v57 = vpop.permute.xlu0 %659  ;;  %v4878_v9 = vld [vmem:[#allocation2 + $0xa8] sm:$0xff]  ;;  %v454_v29 = vrot.slane %v330_v56, 1 }
 0x162   : > { %512 = vrot.lane.b32.xlu1 %v445_v4, %s3660_s29  ;;  %v780_v53 = vsel %vm771_vm5, %v747_v45, %v660_v57 }
 0x163   : > { %2187 = vrot.lane.b32.xlu0 %v4796_v3, %s3660_s29  ;;  %3441 = vmatprep.mubr.msk.f32.mxu1 %vm1323_vm6, %v780_v53  ;;  %v2303_v53 = vsel %vm562_vm4, %v4860_v20, %v2302_v18  ;;  %v4951_v18 = vld [vmem:[#allocation2 + $0x188] sm:$0xff] }
 0x164   : > { %v485_v32 = vpop.permute.xlu1 %484 }
 0x165   : > { %v2160_v31 = vpop.permute.xlu0 %2159  ;;  %v748_v17 = vsel %vm214_vm0, %v4717_v15, %v485_v32  ;;  %v4829_v15 = vld [vmem:[#allocation2 + $0x150] sm:$0xff] }
 0x166   : > { %689 = vrot.lane.b32.xlu1 %v622_v24, %s3661_s30  ;;  %v2423_v47 = vsel %vm214_vm0, %v4818_v36, %v2160_v31  ;;  %v2123_v60 = vrot.slane %v4829_v15, 1 }
 0x167   : > { %2363 = vrot.lane.b32.xlu0 %v4811_v6, %s3661_s30 }
 0x168   : > { %v662_v16 = vpop.permute.xlu1 %661  ;;  %v4856_v43 = vsel %vm385_vm3, %v2123_v60, %v4842_v8  ;;  %v4920_v60 = vrot.slane %v4891_v35, 2 }
 0x169   : > { %v781_v7 = vsel %vm771_vm5, %v748_v17, %v662_v16  ;;  %v2336_v1 = vpop.permute.xlu0 %2335  ;;  %v4902_v16 = vrot.slane %v4891_v35, 1 }
 0x16a   : > { %2189 = vrot.lane.b32.xlu1 %v2122_v23, %s3660_s29  ;;  %3442 = vmatmul.mubr.msk.f32.gmra.mxu1 %vm1323_vm6, %v781_v7  ;;  %v2455_v22 = vsel %vm771_vm5, %v2423_v47, %v2336_v1  ;;  %v4896_v23 = vld [vmem:[#allocation2 + $0xb0] sm:$0xff]  ;;  %v631_v1 = vrot.slane %v330_v56, 2  ;;  %v2308_v51 = vsel %vm562_vm4, %v4920_v60, %v2307_v39 }
 0x16b   : > { %2365 = vrot.lane.b32.xlu0 %v2298_v2, %s3661_s30  ;;  %3495 = vmatprep.mubr.msk.f32.mxu0 %vm1323_vm6, %v2455_v22  ;;  %v455_v2 = vsel %vm385_vm3, %v4782_v33, %v454_v29 }
 0x16c   : > { %v2162_v25 = vpop.permute.xlu1 %2161 }
 0x16d   : > { %v2424_v0 = vsel %vm214_vm0, %v4836_v55, %v2162_v25  ;;  %v2338_v58 = vpop.permute.xlu0 %2337 }
 0x16e   : > { %514 = vrot.lane.b32.xlu1 %v4737_v62, %s3660_s29  ;;  %v2456_v28 = vsel %vm771_vm5, %v2424_v0, %v2338_v58  ;;  %v2299_v62 = vrot.slane %v4829_v15, 2  ;;  %v632_v58 = vsel %vm562_vm4, %v4800_v52, %v631_v1 }
 0x16f   : > { %691 = vrot.lane.b32.xlu0 %v4752_v38, %s3661_s30  ;;  %3496 = vmatmul.mubr.msk.f32.gmra.mxu0 %vm1323_vm6, %v2456_v28  ;;  %v2131_v28 = vrot.slane %v2008_v37, 1 }
 0x170   : > { %v487_v13 = vpop.permute.xlu1 %486  ;;  %v4871_v61 = vsel %vm562_vm4, %v2299_v62, %v4860_v20 }
 0x171   : > { %v749_v10 = vsel %vm214_vm0, %v4758_v30, %v487_v13  ;;  %v664_v12 = vpop.permute.xlu0 %663  ;;  %v2132_v49 = vsel %vm385_vm3, %v4902_v16, %v2131_v28 }
 0x172   : > { %516 = vrot.lane.b32.xlu1 %v450_v27, %s3660_s29  ;;  %v782_v38 = vsel %vm771_vm5, %v749_v10, %v664_v12  ;;  %v4938_v10 = vld [vmem:[#allocation2 + $0xc0] sm:$0xff] }
 0x173   : > { %2191 = vrot.lane.b32.xlu0 %v4856_v43, %s3660_s29  ;;  %3444 = vmatprep.mubr.msk.f32.mxu1 %vm1323_vm6, %v782_v38  ;;  %v333_v38 = vld [vmem:[#allocation2 + $0x160] sm:$0x3] }
 0x174   : > { %v489_v30 = vpop.permute.xlu1 %488  ;;  %v636_v29 = vrot.slane %v333_v38, 2 }
 0x175   : > { %v2164_v4 = vpop.permute.xlu0 %2163  ;;  %v750_v48 = vsel %vm214_vm0, %v4776_v5, %v489_v30  ;;  %v4889_v5 = vld [vmem:[#allocation2 + $0x168] sm:$0xff] }
 0x176   : > { %693 = vrot.lane.b32.xlu1 %v627_v44, %s3661_s30  ;;  %v2425_v14 = vsel %vm214_vm0, %v4878_v9, %v2164_v4  ;;  %v2128_v47 = vrot.slane %v4889_v5, 1 }
 0x177   : > { %2367 = vrot.lane.b32.xlu0 %v4871_v61, %s3661_s30 }
 0x178   : > { %v666_v45 = vpop.permute.xlu1 %665  ;;  %v4916_v0 = vsel %vm385_vm3, %v2128_v47, %v4902_v16 }
 0x179   : > { %v783_v57 = vsel %vm771_vm5, %v750_v48, %v666_v45  ;;  %v2340_v24 = vpop.permute.xlu0 %2339 }
 0x17a   : > { %2193 = vrot.lane.b32.xlu1 %v2127_v42, %s3660_s29  ;;  %3445 = vmatmul.mubr.msk.f32.gmra.mxu1 %vm1323_vm6, %v783_v57  ;;  %v2457_v32 = vsel %vm771_vm5, %v2425_v14, %v2340_v24  ;;  %v459_v42 = vrot.slane %v333_v38, 1  ;;  %v4956_v14 = vld [vmem:[#allocation2 + $0xc8] sm:$0xff]  ;;  %v2134_v57 = vrot.slane %v4951_v18, 1 }
 0x17b   : > { %2369 = vrot.lane.b32.xlu0 %v2303_v53, %s3661_s30  ;;  %3498 = vmatprep.mubr.msk.f32.mxu0 %vm1323_vm6, %v2457_v32 }
 0x17c   : > { %v2166_v31 = vpop.permute.xlu1 %2165  ;;  %v460_v32 = vsel %vm385_vm3, %v4842_v8, %v459_v42 }
 0x17d   : > { %v2426_v17 = vsel %vm214_vm0, %v4896_v23, %v2166_v31  ;;  %v2342_v34 = vpop.permute.xlu0 %2341 }
 0x17e   : > { %518 = vrot.lane.b32.xlu1 %v4796_v3, %s3660_s29  ;;  %v2458_v7 = vsel %vm771_vm5, %v2426_v17, %v2342_v34  ;;  %v2304_v3 = vrot.slane %v4889_v5, 2  ;;  %v2011_v17 = vld [vmem:[#allocation2 + $0x190] sm:$0x3] }
 0x17f   : > { %695 = vrot.lane.b32.xlu0 %v4811_v6, %s3661_s30  ;;  %3499 = vmatmul.mubr.msk.f32.gmra.mxu0 %vm1323_vm6, %v2458_v7  ;;  %v2310_v7 = vrot.slane %v4951_v18, 2  ;;  %v2136_v1 = vrot.slane %v2011_v17, 1  ;;  %v2312_v37 = vrot.slane %v2011_v17, 2 }
 0x180   : > { %v491_v22 = vpop.permute.xlu1 %490  ;;  %v4931_v27 = vsel %vm562_vm4, %v2304_v3, %v4920_v60 }
 0x181   : > { %v751_v25 = vsel %vm214_vm0, %v4818_v36, %v491_v22  ;;  %v668_v33 = vpop.permute.xlu0 %667  ;;  %v2137_v3 = vsel %vm385_vm3, %v2134_v57, %v2136_v1 }
 0x182   : > { %520 = vrot.lane.b32.xlu1 %v455_v2, %s3660_s29  ;;  %v784_v6 = vsel %vm771_vm5, %v751_v25, %v668_v33 }
 0x183   : > { %2195 = vrot.lane.b32.xlu0 %v4916_v0, %s3660_s29  ;;  %3447 = vmatprep.mubr.msk.f32.mxu1 %vm1323_vm6, %v784_v6 }
 0x184   : > { %v493_v36 = vpop.permute.xlu1 %492 }
 0x185   : > { %v2168_v13 = vpop.permute.xlu0 %2167  ;;  %v752_v52 = vsel %vm214_vm0, %v4836_v55, %v493_v36  ;;  %v4949_v55 = vld [vmem:[#allocation2 + $0x180] sm:$0xff]  ;;  %v2313_v36 = vsel %vm562_vm4, %v2310_v7, %v2312_v37 }
 0x186   : > { %697 = vrot.lane.b32.xlu1 %v632_v58, %s3661_s30  ;;  %v2427_v62 = vsel %vm214_vm0, %v4938_v10, %v2168_v13  ;;  %v2133_v56 = vrot.slane %v4949_v55, 1  ;;  %v336_v58 = vld [vmem:[#allocation2 + $0x178] sm:$0x3] }
 0x187   : > { %2371 = vrot.lane.b32.xlu0 %v4931_v27, %s3661_s30  ;;  %v4993_v13 = vld [vmem:[#allocation2 + $0x198] sm:$0xff]  ;;  %v641_v42 = vrot.slane %v336_v58, 2 }
 0x188   : > { %v670_v12 = vpop.permute.xlu1 %669  ;;  %v2135_v34 = vsel %vm385_vm3, %v2133_v56, %v2134_v57  ;;  %v2138_v38 = vrot.slane %v4993_v13, 1 }
 0x189   : > { %v785_v44 = vsel %vm771_vm5, %v752_v52, %v670_v12  ;;  %v2344_v30 = vpop.permute.xlu0 %2343  ;;  %v464_v52 = vrot.slane %v336_v58, 1 }
 0x18a   : > { %2197 = vrot.lane.b32.xlu1 %v2132_v49, %s3660_s29  ;;  %3448 = vmatmul.mubr.msk.f32.gmra.mxu1 %vm1323_vm6, %v785_v44  ;;  %v2459_v4 = vsel %vm771_vm5, %v2427_v62, %v2344_v30  ;;  %v4995_v49 = vld [vmem:[#allocation2 + $0x1a0] sm:$0xff] }
 0x18b   : > { %2373 = vrot.lane.b32.xlu0 %v2308_v51, %s3661_s30  ;;  %3501 = vmatprep.mubr.msk.f32.mxu0 %vm1323_vm6, %v2459_v4  ;;  %v2139_v44 = vrot.slane %v4995_v49, 1  ;;  %v465_v4 = vsel %vm385_vm3, %v4902_v16, %v464_v52 }
 0x18c   : > { %v2170_v48 = vpop.permute.xlu1 %2169 }
 0x18d   : > { %v2428_v45 = vsel %vm214_vm0, %v4956_v14, %v2170_v48  ;;  %v2346_v53 = vpop.permute.xlu0 %2345  ;;  %v2140_v57 = vsel %vm385_vm3, %v2138_v38, %v2139_v44 }
 0x18e   : > { %522 = vrot.lane.b32.xlu1 %v4856_v43, %s3660_s29  ;;  %v2460_v24 = vsel %vm771_vm5, %v2428_v45, %v2346_v53  ;;  %v2309_v43 = vrot.slane %v4949_v55, 2  ;;  %v2014_v45 = vld [vmem:[#allocation2 + $0x1a8] sm:$0x3]  ;;  %v2315_v53 = vrot.slane %v4995_v49, 2 }
 0x18f   : > { %699 = vrot.lane.b32.xlu0 %v4871_v61, %s3661_s30  ;;  %3502 = vmatmul.mubr.msk.f32.gmra.mxu0 %vm1323_vm6, %v2460_v24  ;;  %v637_v61 = vsel %vm562_vm4, %v4860_v20, %v636_v29 }
 0x190   : > { %v495_v31 = vpop.permute.xlu1 %494  ;;  %v2311_v22 = vsel %vm562_vm4, %v2309_v43, %v2310_v7 }
 0x191   : > { %v753_v47 = vsel %vm214_vm0, %v4878_v9, %v495_v31  ;;  %v672_v2 = vpop.permute.xlu0 %671 }
 0x192   : > { %524 = vrot.lane.b32.xlu1 %v460_v32, %s3660_s29  ;;  %v786_v8 = vsel %vm771_vm5, %v753_v47, %v672_v2  ;;  %v2141_v32 = vrot.slane %v2014_v45, 1  ;;  %v2317_v47 = vrot.slane %v2014_v45, 2 }
 0x193   : > { %2199 = vrot.lane.b32.xlu0 %v2135_v34, %s3660_s29  ;;  %3450 = vmatprep.mubr.msk.f32.mxu1 %vm1323_vm6, %v786_v8 }
 0x194   : > { %v497_v9 = vpop.permute.xlu1 %496  ;;  %v2142_v17 = vsel %vm385_vm3, %v2139_v44, %v2141_v32 }
 0x195   : > { %v2172_v25 = vpop.permute.xlu0 %2171  ;;  %v754_v33 = vsel %vm214_vm0, %v4896_v23, %v497_v9 }
 0x196   : > { %701 = vrot.lane.b32.xlu1 %v637_v61, %s3661_s30  ;;  %v2429_v20 = vsel %vm214_vm0, %v4525_v21, %v2172_v25  ;;  %v2318_v61 = vsel %vm562_vm4, %v2315_v53, %v2317_v47 }
 0x197   : > { %2375 = vrot.lane.b32.xlu0 %v2311_v22, %s3661_s30 }
 0x198   : > { %v674_v6 = vpop.permute.xlu1 %673 }
 0x199   : > { %v787_v28 = vsel %vm771_vm5, %v754_v33, %v674_v6  ;;  %v2348_v39 = vpop.permute.xlu0 %2347 }
 0x19a   : > { %2201 = vrot.lane.b32.xlu1 %v2137_v3, %s3660_s29  ;;  %3451 = vmatmul.mubr.msk.f32.gmra.mxu1 %vm1323_vm6, %v787_v28  ;;  %v2461_v23 = vsel %vm771_vm5, %v2429_v20, %v2348_v39 }
 0x19b   : > { %2377 = vrot.lane.b32.xlu0 %v2313_v36, %s3661_s30  ;;  %3504 = vmatprep.mubr.msk.f32.mxu0 %vm1323_vm6, %v2461_v23 }
 0x19c   : > { %v2174_v62 = vpop.permute.xlu1 %2173 }
 0x19d   : > { %v2430_v12 = vsel %vm214_vm0, %v4527_v40, %v2174_v62  ;;  %v2350_v51 = vpop.permute.xlu0 %2349 }
 0x19e   : > { %526 = vrot.lane.b32.xlu1 %v4916_v0, %s3660_s29  ;;  %v2462_v30 = vsel %vm771_vm5, %v2430_v12, %v2350_v51  ;;  %v2314_v0 = vrot.slane %v4993_v13, 2 }
 0x19f   : > { %703 = vrot.lane.b32.xlu0 %v4931_v27, %s3661_s30  ;;  %3505 = vmatmul.mubr.msk.f32.gmra.mxu0 %vm1323_vm6, %v2462_v30  ;;  %v642_v27 = vsel %vm562_vm4, %v4920_v60, %v641_v42 }
 0x1a0   : > { %v499_v48 = vpop.permute.xlu1 %498 }
 0x1a1   : > { %v755_v56 = vsel %vm214_vm0, %v4938_v10, %v499_v48  ;;  %v676_v24 = vpop.permute.xlu0 %675  ;;  %v2316_v10 = vsel %vm562_vm4, %v2314_v0, %v2315_v53  ;;  %v5070_v53 = vpop.f32.mrf.mxu0 }
 0x1a2   : > { %528 = vrot.lane.b32.xlu1 %v465_v4, %s3660_s29  ;;  %v788_v16 = vsel %vm771_vm5, %v755_v56, %v676_v24  ;;  %v5061_v4 = vpop.f32.mrf.mxu1 }
 0x1a3   : > { %3453 = vmatprep.mubr.msk.f32.mxu1 %vm1323_vm6, %v788_v16  ;;  %2203 = vrot.lane.b32.xlu0 %v2140_v57, %s3660_s29 }
 0x1a4   : > { %v501_v29 = vpop.permute.xlu1 %500  ;;  %v5064_v45 = vpop.f32.mrf.mxu1 }
 0x1a5   : > { %v2176_v31 = vpop.permute.xlu0 %2175  ;;  %v756_v34 = vsel %vm214_vm0, %v4956_v14, %v501_v29  ;;  %v5078_v29 = vpop.f32.mrf.mxu0 }
 0x1a6   : > { %705 = vrot.lane.b32.xlu1 %v642_v27, %s3661_s30  ;;  %v2431_v60 = vsel %vm214_vm0, %v4581_v50, %v2176_v31  ;;  %v5073_v24 = vpop.f32.mrf.mxu1 }
 0x1a7   : > { %2379 = vrot.lane.b32.xlu0 %v2316_v10, %s3661_s30 }
 0x1a8   : > { %v678_v43 = vpop.permute.xlu1 %677  ;;  %v5082_v10 = vpop.f32.mrf.mxu1 }
 0x1a9   : > { %v789_v7 = vsel %vm771_vm5, %v756_v34, %v678_v43  ;;  %v2352_v2 = vpop.permute.xlu0 %2351 }
 0x1aa   : > { %2205 = vrot.lane.b32.xlu1 %v2142_v17, %s3660_s29  ;;  %3454 = vmatmul.mubr.msk.f32.gmra.mxu1 %vm1323_vm6, %v789_v7  ;;  %v2463_v8 = vsel %vm771_vm5, %v2431_v60, %v2352_v2  ;;  %v5084_v17 = vpop.f32.mrf.mxu0  ;;  %v5087_v34 = vpop.f32.mrf.mxu1 }
 0x1ab   : > { %3507 = vmatprep.mubr.msk.f32.mxu0 %vm1323_vm6, %v2463_v8 }
 0x1ac   : > { %v2178_v1 = vpop.permute.xlu1 %2177  ;;  %v5092_v2 = vpop.f32.mrf.mxu0 }
 0x1ad   : > { %v2432_v14 = vsel %vm214_vm0, %v4583_v59, %v2178_v1  ;;  %v2354_v9 = vpop.permute.xlu0 %2353 }
 0x1ae   : > { %2381 = vrot.lane.b32.xlu1 %v2318_v61, %s3661_s30  ;;  %v2464_v22 = vsel %vm771_vm5, %v2432_v14, %v2354_v9  ;;  %v5095_v61 = vpop.f32.mrf.mxu1  ;;  %v5098_v14 = vpop.f32.mrf.mxu0 }
 0x1af   : > { %3508 = vmatmul.mubr.msk.f32.gmra.mxu0 %vm1323_vm6, %v2464_v22 }
 0x1b0   : > { %v503_v37 = vpop.permute.xlu1 %502  ;;  %v5100_v9 = vpop.f32.mrf.mxu1 }
 0x1b1   : > { %v757_v25 = vsel %vm214_vm0, %v4525_v21, %v503_v37  ;;  %v680_v3 = vpop.permute.xlu0 %679 }
 0x1b2   : > { %v790_v33 = vsel %vm771_vm5, %v757_v25, %v680_v3  ;;  %v5106_v3 = vpop.f32.mrf.mxu0 }
 0x1b3   : > { %3456 = vmatprep.mubr.msk.f32.mxu1 %vm1323_vm6, %v790_v33 }
 0x1b4   : > { %v505_v20 = vpop.permute.xlu1 %504 }
 0x1b5   : > { %v2180_v6 = vpop.permute.xlu0 %2179  ;;  %v758_v58 = vsel %vm214_vm0, %v4527_v40, %v505_v20  ;;  %v5109_v20 = vpop.f32.mrf.mxu1 }
 0x1b6   : > { %v2433_v28 = vsel %vm214_vm0, %v4644_v63, %v2180_v6 }
 0x1b8   : > { %v682_v36 = vpop.permute.xlu1 %681 }
 0x1b9   : > { %v791_v39 = vsel %vm771_vm5, %v758_v58, %v682_v36  ;;  %v2356_v23 = vpop.permute.xlu0 %2355  ;;  %v5112_v58 = vpop.f32.mrf.mxu0 }
 0x1ba   : > { %3457 = vmatmul.mubr.msk.f32.gmra.mxu1 %vm1323_vm6, %v791_v39  ;;  %v2465_v21 = vsel %vm771_vm5, %v2433_v28, %v2356_v23  ;;  %v5115_v36 = vpop.f32.mrf.mxu1 }
 0x1bb   : > { %3510 = vmatprep.mubr.msk.f32.mxu0 %vm1323_vm6, %v2465_v21  ;;  %v5120_v21 = vpop.f32.mrf.mxu0 }
 0x1bc   : > { %v2182_v52 = vpop.permute.xlu1 %2181 }
 0x1bd   : > { %v2434_v62 = vsel %vm214_vm0, %v4646_v46, %v2182_v52  ;;  %v2358_v12 = vpop.permute.xlu0 %2357 }
 0x1be   : > { %v2466_v40 = vsel %vm771_vm5, %v2434_v62, %v2358_v12  ;;  %v5123_v62 = vpop.f32.mrf.mxu1 }
 0x1bf   : > { %3511 = vmatmul.mubr.msk.f32.gmra.mxu0 %vm1323_vm6, %v2466_v40  ;;  %v5126_v40 = vpop.f32.mrf.mxu0 }
 0x1c0   : > { %v507_v38 = vpop.permute.xlu1 %506 }
 0x1c1   : > { %v759_v44 = vsel %vm214_vm0, %v4581_v50, %v507_v38  ;;  %v684_v51 = vpop.permute.xlu0 %683 }
 0x1c2   : > { %v792_v30 = vsel %vm771_vm5, %v759_v44, %v684_v51 }
 0x1c3   : > { %3459 = vmatprep.mubr.msk.f32.mxu1 %vm1323_vm6, %v792_v30  ;;  %v5130_v44 = vpop.f32.mrf.mxu1 }
 0x1c4   : > { %v509_v42 = vpop.permute.xlu1 %508 }
 0x1c5   : > { %v2184_v48 = vpop.permute.xlu0 %2183  ;;  %v760_v56 = vsel %vm214_vm0, %v4583_v59, %v509_v42 }
 0x1c6   : > { %v2435_v57 = vsel %vm214_vm0, %v4710_v19, %v2184_v48  ;;  %v5134_v48 = vpop.f32.mrf.mxu0 }
 0x1c8   : > { %v686_v0 = vpop.permute.xlu1 %685 }
 0x1c9   : > { %v793_v50 = vsel %vm771_vm5, %v760_v56, %v686_v0  ;;  %v2360_v16 = vpop.permute.xlu0 %2359  ;;  %v5136_v56 = vpop.f32.mrf.mxu1 }
 0x1ca   : > { %3460 = vmatmul.mubr.msk.f32.gmra.mxu1 %vm1323_vm6, %v793_v50  ;;  %v2467_v27 = vsel %vm771_vm5, %v2435_v57, %v2360_v16 }
 0x1cb   : > { %3513 = vmatprep.mubr.msk.f32.mxu0 %vm1323_vm6, %v2467_v27  ;;  %v5138_v0 = vpop.f32.mrf.mxu0 }
 0x1cc   : > { %v2186_v32 = vpop.permute.xlu1 %2185 }
 0x1cd   : > { %v2436_v59 = vsel %vm214_vm0, %v4712_v26, %v2186_v32  ;;  %v2362_v31 = vpop.permute.xlu0 %2361 }
 0x1ce   : > { %v2468_v47 = vsel %vm771_vm5, %v2436_v59, %v2362_v31  ;;  %v5148_v31 = vpop.f32.mrf.mxu0 }
 0x1cf   : > { %3514 = vmatmul.mubr.msk.f32.gmra.mxu0 %vm1323_vm6, %v2468_v47 }
 0x1d0   : > { %v511_v60 = vpop.permute.xlu1 %510 }
 0x1d1   : > { %v761_v43 = vsel %vm214_vm0, %v4644_v63, %v511_v60  ;;  %v688_v7 = vpop.permute.xlu0 %687 }
 0x1d2   : > { %v794_v8 = vsel %vm771_vm5, %v761_v43, %v688_v7 }
 0x1d3   : > { %3462 = vmatprep.mubr.msk.f32.mxu1 %vm1323_vm6, %v794_v8  ;;  %v5140_v50 = vpop.f32.mrf.mxu1 }
 0x1d4   : > { %v513_v1 = vpop.permute.xlu1 %512 }
 0x1d5   : > { %v2188_v22 = vpop.permute.xlu0 %2187  ;;  %v762_v37 = vsel %vm214_vm0, %v4646_v46, %v513_v1  ;;  %v5151_v60 = vpop.f32.mrf.mxu1 }
 0x1d6   : > { %v2437_v63 = vsel %vm214_vm0, %v4769_v11, %v2188_v22 }
 0x1d8   : > { %v690_v25 = vpop.permute.xlu1 %689 }
 0x1d9   : > { %v795_v33 = vsel %vm771_vm5, %v762_v37, %v690_v25  ;;  %v2364_v6 = vpop.permute.xlu0 %2363 }
 0x1da   : > { %3463 = vmatmul.mubr.msk.f32.gmra.mxu1 %vm1323_vm6, %v795_v33  ;;  %v2469_v28 = vsel %vm771_vm5, %v2437_v63, %v2364_v6 }
 0x1db   : > { %3516 = vmatprep.mubr.msk.f32.mxu0 %vm1323_vm6, %v2469_v28  ;;  %v5154_v7 = vpop.f32.mrf.mxu0 }
 0x1dc   : > { %v2190_v46 = vpop.permute.xlu1 %2189 }
 0x1dd   : > { %v2438_v39 = vsel %vm214_vm0, %v4771_v54, %v2190_v46  ;;  %v2366_v23 = vpop.permute.xlu0 %2365  ;;  %v5162_v63 = vpop.f32.mrf.mxu0 }
 0x1de   : > { %v2470_v52 = vsel %vm771_vm5, %v2438_v39, %v2366_v23 }
 0x1df   : > { %3517 = vmatmul.mubr.msk.f32.gmra.mxu0 %vm1323_vm6, %v2470_v52 }
 0x1e0   : > { %v515_v12 = vpop.permute.xlu1 %514 }
 0x1e1   : > { %v763_v38 = vsel %vm214_vm0, %v4710_v19, %v515_v12  ;;  %v692_v51 = vpop.permute.xlu0 %691 }
 0x1e2   : > { %v796_v30 = vsel %vm771_vm5, %v763_v38, %v692_v51 }
 0x1e3   : > { %3465 = vmatprep.mubr.msk.f32.mxu1 %vm1323_vm6, %v796_v30  ;;  %v5158_v8 = vpop.f32.mrf.mxu1 }
 0x1e4   : > { %v517_v42 = vpop.permute.xlu1 %516 }
 0x1e5   : > { %v2192_v57 = vpop.permute.xlu0 %2191  ;;  %v764_v19 = vsel %vm214_vm0, %v4712_v26, %v517_v42  ;;  %v5166_v33 = vpop.f32.mrf.mxu1 }
 0x1e6   : > { %v2439_v16 = vsel %vm214_vm0, %v4829_v15, %v2192_v57 }
 0x1e8   : > { %v694_v27 = vpop.permute.xlu1 %693 }
 0x1e9   : > { %v797_v32 = vsel %vm771_vm5, %v764_v19, %v694_v27  ;;  %v2368_v59 = vpop.permute.xlu0 %2367 }
 0x1ea   : > { %3466 = vmatmul.mubr.msk.f32.gmra.mxu1 %vm1323_vm6, %v797_v32  ;;  %v2471_v47 = vsel %vm771_vm5, %v2439_v16, %v2368_v59 }
 0x1eb   : > { %3519 = vmatprep.mubr.msk.f32.mxu0 %vm1323_vm6, %v2471_v47 }
 0x1ec   : > { %v2194_v43 = vpop.permute.xlu1 %2193 }
 0x1ed   : > { %v2440_v26 = vsel %vm214_vm0, %v4831_v41, %v2194_v43  ;;  %v2370_v1 = vpop.permute.xlu0 %2369 }
 0x1ee   : > { %v2472_v22 = vsel %vm771_vm5, %v2440_v26, %v2370_v1  ;;  %v5168_v28 = vpop.f32.mrf.mxu0 }
 0x1ef   : > { %3520 = vmatmul.mubr.msk.f32.gmra.mxu0 %vm1323_vm6, %v2472_v22 }
 0x1f0   : > { %v519_v37 = vpop.permute.xlu1 %518  ;;  %v5172_v12 = vpop.f32.mrf.mxu0 }
 0x1f1   : > { %v765_v25 = vsel %vm214_vm0, %v4769_v11, %v519_v37  ;;  %v696_v6 = vpop.permute.xlu0 %695 }
 0x1f2   : > { %v798_v46 = vsel %vm771_vm5, %v765_v25, %v696_v6  ;;  %v3431_v39 = vpop.f32.mrf.mxu1 }
 0x1f3   : > { %3468 = vmatprep.mubr.msk.f32.mxu1 %vm1323_vm6, %v798_v46  ;;  %v1813_v42 = vadd.f32 %v3431_v39, %v5070_v53 }
 0x1f4   : > { %v521_v23 = vpop.permute.xlu1 %520  ;;  %v1807_v38 = vpop.f32.mrf.mxu1 }
 0x1f5   : > { %v2196_v52 = vpop.permute.xlu0 %2195  ;;  %v766_v51 = vsel %vm214_vm0, %v4771_v54, %v521_v23  ;;  %v1808_v16 = vadd.f32 %v1807_v38, %v5078_v29 }
 0x1f6   : > { %v2441_v11 = vsel %vm214_vm0, %v4889_v5, %v2196_v52 }
 0x1f8   : > { %v698_v30 = vpop.permute.xlu1 %697 }
 0x1f9   : > { %v799_v57 = vsel %vm771_vm5, %v766_v51, %v698_v30  ;;  %v2372_v19 = vpop.permute.xlu0 %2371 }
 0x1fa   : > { %3469 = vmatmul.mubr.msk.f32.gmra.mxu1 %vm1323_vm6, %v799_v57  ;;  %v3485_v54 = vpop.f32.mrf.mxu0  ;;  %v2473_v27 = vsel %vm771_vm5, %v2441_v11, %v2372_v19 }
 0x1fb   : > { %v2805_v32 = vadd.f32 %v3485_v54, %v1813_v42  ;;  %3522 = vmatprep.mubr.msk.f32.mxu0 %vm1323_vm6, %v2473_v27 }
 0x1fc   : > { %v2645_v53 = vpop.f32.mrf.mxu0  ;;  %v2198_v59 = vpop.permute.xlu1 %2197 }
 0x1fd   : > { %2837 = vst.msk [vmem:[%s5186_s8 + $0x8] sm:$0xff] %vm214_vm0, %v2805_v32  ;;  %v2938_v47 = vmul.f32 %v2805_v32, %v2805_v32  ;;  %v2804_v43 = vadd.f32 %v2645_v53, %v1808_v16  ;;  %v2442_v26 = vsel %vm214_vm0, %v4891_v35, %v2198_v59  ;;  %v2374_v1 = vpop.permute.xlu0 %2373  ;;  %v2869_v22 = vsel %vm214_vm0, %v2805_v32, 0.0 }
 0x1fe   : > { %v2474_v25 = vsel %vm771_vm5, %v2442_v26, %v2374_v1  ;;  %v3434_v46 = vpop.f32.mrf.mxu1 }
 0x1ff   : > { %2836 = vst.msk [vmem:[%s5186_s8] sm:$0xff] %vm214_vm0, %v2804_v43  ;;  %v2868_v29 = vsel %vm214_vm0, %v2804_v43, 0.0  ;;  %v2937_v37 = vmul.f32 %v2804_v43, %v2804_v43  ;;  %3523 = vmatmul.mubr.msk.f32.gmra.mxu0 %vm1323_vm6, %v2474_v25  ;;  %v2970_v23 = vsel %vm214_vm0, %v2938_v47, 0.0  ;;  %v1823_v19 = vadd.f32 %v3434_v46, %v5084_v17 }
 0x200   : > { %v2870_v6 = vadd.f32 %v2869_v22, %v2868_v29  ;;  %v523_v39 = vpop.permute.xlu1 %522  ;;  %v1817_v42 = vpop.f32.mrf.mxu1 }
 0x201   : > { %v2969_v52 = vsel %vm214_vm0, %v2937_v37, 0.0  ;;  %v767_v38 = vsel %vm214_vm0, %v4829_v15, %v523_v39  ;;  %v700_v11 = vpop.permute.xlu0 %699  ;;  %v1818_v27 = vadd.f32 %v1817_v42, %v5092_v2 }
 0x202   : > { %v2971_v51 = vadd.f32 %v2970_v23, %v2969_v52  ;;  %v800_v30 = vsel %vm771_vm5, %v767_v38, %v700_v11 }
 0x203   : > { %3471 = vmatprep.mubr.msk.f32.mxu1 %vm1323_vm6, %v800_v30 }
 0x204   : > { %v525_v57 = vpop.permute.xlu1 %524 }
 0x205   : > { %v2200_v54 = vpop.permute.xlu0 %2199  ;;  %v768_v15 = vsel %vm214_vm0, %v4831_v41, %v525_v57 }
 0x206   : > { %v3488_v16 = vpop.f32.mrf.mxu0  ;;  %v2443_v53 = vsel %vm214_vm0, %v4949_v55, %v2200_v54 }
 0x207   : > { %v2807_v32 = vadd.f32 %v3488_v16, %v1823_v19 }
 0x208   : > { %v2655_v59 = vpop.f32.mrf.mxu0  ;;  %v702_v47 = vpop.permute.xlu1 %701 }
 0x209   : > { %2839 = vst.msk [vmem:[%s5186_s8 + $0x18] sm:$0xff] %vm214_vm0, %v2807_v32  ;;  %v2806_v43 = vadd.f32 %v2655_v59, %v1818_v27  ;;  %v801_v26 = vsel %vm771_vm5, %v768_v15, %v702_v47  ;;  %v2376_v17 = vpop.permute.xlu0 %2375  ;;  %v2940_v22 = vmul.f32 %v2807_v32, %v2807_v32  ;;  %v2873_v25 = vsel %vm214_vm0, %v2807_v32, 0.0 }
 0x20a   : > { %v3437_v1 = vpop.f32.mrf.mxu1  ;;  %3472 = vmatmul.mubr.msk.f32.gmra.mxu1 %vm1323_vm6, %v801_v26  ;;  %v2475_v29 = vsel %vm771_vm5, %v2443_v53, %v2376_v17 }
 0x20b   : > { %2838 = vst.msk [vmem:[%s5186_s8 + $0x10] sm:$0xff] %vm214_vm0, %v2806_v43  ;;  %v2871_v2 = vsel %vm214_vm0, %v2806_v43, 0.0  ;;  %v2939_v41 = vmul.f32 %v2806_v43, %v2806_v43  ;;  %3525 = vmatprep.mubr.msk.f32.mxu0 %vm1323_vm6, %v2475_v29  ;;  %v2974_v30 = vsel %vm214_vm0, %v2940_v22, 0.0  ;;  %v1833_v42 = vadd.f32 %v3437_v1, %v5098_v14 }
 0x20c   : > { %v2872_v55 = vadd.f32 %v2871_v2, %v2870_v6  ;;  %v2202_v37 = vpop.permute.xlu1 %2201  ;;  %v1827_v52 = vpop.f32.mrf.mxu1 }
 0x20d   : > { %v2972_v46 = vsel %vm214_vm0, %v2939_v41, 0.0  ;;  %v2444_v39 = vsel %vm214_vm0, %v4951_v18, %v2202_v37  ;;  %v2378_v38 = vpop.permute.xlu0 %2377  ;;  %v1828_v16 = vadd.f32 %v1827_v52, %v5106_v3 }
 0x20e   : > { %v2973_v23 = vadd.f32 %v2972_v46, %v2971_v51  ;;  %v2874_v11 = vadd.f32 %v2873_v25, %v2872_v55  ;;  %v2476_v6 = vsel %vm771_vm5, %v2444_v39, %v2378_v38 }
 0x20f   : > { %v3491_v57 = vpop.f32.mrf.mxu0  ;;  %3526 = vmatmul.mubr.msk.f32.gmra.mxu0 %vm1323_vm6, %v2476_v6 }
 0x210   : > { %v527_v19 = vpop.permute.xlu1 %526  ;;  %v2975_v54 = vadd.f32 %v2974_v30, %v2973_v23  ;;  %v2809_v18 = vadd.f32 %v3491_v57, %v1833_v42 }
 0x211   : > { %v769_v51 = vsel %vm214_vm0, %v4889_v5, %v527_v19  ;;  %v704_v27 = vpop.permute.xlu0 %703  ;;  %v2665_v32 = vpop.f32.mrf.mxu0 }
 0x212   : > { %2841 = vst.msk [vmem:[%s5186_s8 + $0x28] sm:$0xff] %vm214_vm0, %v2809_v18  ;;  %v802_v14 = vsel %vm771_vm5, %v769_v51, %v704_v27  ;;  %v2808_v15 = vadd.f32 %v2665_v32, %v1828_v16  ;;  %v2942_v59 = vmul.f32 %v2809_v18, %v2809_v18  ;;  %v2877_v5 = vsel %vm214_vm0, %v2809_v18, 0.0 }
 0x213   : > { %3474 = vmatprep.mubr.msk.f32.mxu1 %vm1323_vm6, %v802_v14 }
 0x214   : > { %v529_v53 = vpop.permute.xlu1 %528  ;;  %2840 = vst.msk [vmem:[%s5186_s8 + $0x20] sm:$0xff] %vm214_vm0, %v2808_v15  ;;  %v2875_v47 = vsel %vm214_vm0, %v2808_v15, 0.0  ;;  %v2941_v3 = vmul.f32 %v2808_v15, %v2808_v15  ;;  %v2978_v55 = vsel %vm214_vm0, %v2942_v59, 0.0 }
 0x215   : > { %v2876_v43 = vadd.f32 %v2875_v47, %v2874_v11  ;;  %v2204_v26 = vpop.permute.xlu0 %2203  ;;  %v770_v22 = vsel %vm214_vm0, %v4891_v35, %v529_v53 }
 0x216   : > { %v2976_v17 = vsel %vm214_vm0, %v2941_v3, 0.0  ;;  %v2445_v2 = vsel %vm214_vm0, %v4993_v13, %v2204_v26 }
 0x217   : > { %v2977_v1 = vadd.f32 %v2976_v17, %v2975_v54  ;;  %v2878_v29 = vadd.f32 %v2877_v5, %v2876_v43 }
 0x218   : > { %v706_v41 = vpop.permute.xlu1 %705 }
 0x219   : > { %v803_v37 = vsel %vm771_vm5, %v770_v22, %v706_v41  ;;  %v2380_v46 = vpop.permute.xlu0 %2379  ;;  %v2979_v39 = vadd.f32 %v2978_v55, %v2977_v1 }
 0x21a   : > { %v3440_v25 = vpop.f32.mrf.mxu1  ;;  %3475 = vmatmul.mubr.msk.f32.gmra.mxu1 %vm1323_vm6, %v803_v37  ;;  %v2477_v23 = vsel %vm771_vm5, %v2445_v2, %v2380_v46 }
 0x21b   : > { %3528 = vmatprep.mubr.msk.f32.mxu0 %vm1323_vm6, %v2477_v23  ;;  %v1843_v13 = vadd.f32 %v3440_v25, %v5112_v58 }
 0x21c   : > { %v2206_v52 = vpop.permute.xlu1 %2205  ;;  %v1837_v35 = vpop.f32.mrf.mxu1 }
 0x21d   : > { %v2446_v38 = vsel %vm214_vm0, %v4995_v49, %v2206_v52  ;;  %v1838_v42 = vadd.f32 %v1837_v35, %v5120_v21 }
 0x21f   : > { %v3494_v11 = vpop.f32.mrf.mxu0 }
 0x220   : > { %v2382_v30 = vpop.permute.xlu1 %2381  ;;  %v2811_v6 = vadd.f32 %v3494_v11, %v1843_v13 }
 0x221   : > { %v2478_v57 = vsel %vm771_vm5, %v2446_v38, %v2382_v30  ;;  %v2675_v19 = vpop.f32.mrf.mxu0 }
 0x222   : > { %3529 = vmatmul.mubr.msk.f32.gmra.mxu0 %vm1323_vm6, %v2478_v57  ;;  %2843 = vst.msk [vmem:[%s5186_s8 + $0x38] sm:$0xff] %vm214_vm0, %v2811_v6  ;;  %v2810_v54 = vadd.f32 %v2675_v19, %v1838_v42  ;;  %v2944_v16 = vmul.f32 %v2811_v6, %v2811_v6  ;;  %v2881_v51 = vsel %vm214_vm0, %v2811_v6, 0.0 }
 0x224   : > { %2842 = vst.msk [vmem:[%s5186_s8 + $0x30] sm:$0xff] %vm214_vm0, %v2810_v54  ;;  %v2879_v58 = vsel %vm214_vm0, %v2810_v54, 0.0  ;;  %v2943_v49 = vmul.f32 %v2810_v54, %v2810_v54  ;;  %v2982_v14 = vsel %vm214_vm0, %v2944_v16, 0.0 }
 0x225   : > { %v2880_v18 = vadd.f32 %v2879_v58, %v2878_v29 }
 0x226   : > { %v2980_v21 = vsel %vm214_vm0, %v2943_v49, 0.0 }
 0x227   : > { %v2981_v27 = vadd.f32 %v2980_v21, %v2979_v39  ;;  %v2882_v32 = vadd.f32 %v2881_v51, %v2880_v18 }
 0x229   : > { %v2983_v53 = vadd.f32 %v2982_v14, %v2981_v27 }
 0x22a   : > { %v3443_v15 = vpop.f32.mrf.mxu1 }
 0x22b   : > { %v1853_v47 = vadd.f32 %v3443_v15, %v5126_v40 }
 0x22c   : > { %v1847_v59 = vpop.f32.mrf.mxu1 }
 0x22d   : > { %v1848_v43 = vadd.f32 %v1847_v59, %v5134_v48 }
 0x22f   : > { %v3497_v3 = vpop.f32.mrf.mxu0 }
 0x230   : > { %v2813_v26 = vadd.f32 %v3497_v3, %v1853_v47 }
 0x231   : > { %v2685_v5 = vpop.f32.mrf.mxu0 }
 0x232   : > { %2845 = vst.msk [vmem:[%s5186_s8 + $0x48] sm:$0xff] %vm214_vm0, %v2813_v26  ;;  %v2812_v17 = vadd.f32 %v2685_v5, %v1848_v43  ;;  %v2946_v1 = vmul.f32 %v2813_v26, %v2813_v26  ;;  %v2885_v29 = vsel %vm214_vm0, %v2813_v26, 0.0 }
 0x234   : > { %2844 = vst.msk [vmem:[%s5186_s8 + $0x40] sm:$0xff] %vm214_vm0, %v2812_v17  ;;  %v2883_v22 = vsel %vm214_vm0, %v2812_v17, 0.0  ;;  %v2945_v2 = vmul.f32 %v2812_v17, %v2812_v17  ;;  %v2986_v37 = vsel %vm214_vm0, %v2946_v1, 0.0 }
 0x235   : > { %v2884_v41 = vadd.f32 %v2883_v22, %v2882_v32 }
 0x236   : > { %v2984_v40 = vsel %vm214_vm0, %v2945_v2, 0.0 }
 0x237   : > { %v2985_v55 = vadd.f32 %v2984_v40, %v2983_v53  ;;  %v2886_v48 = vadd.f32 %v2885_v29, %v2884_v41 }
 0x239   : > { %v2987_v46 = vadd.f32 %v2986_v37, %v2985_v55 }
 0x23a   : > { %v3446_v25 = vpop.f32.mrf.mxu1 }
 0x23b   : > { %v1863_v23 = vadd.f32 %v3446_v25, %v5138_v0 }
 0x23c   : > { %v1857_v39 = vpop.f32.mrf.mxu1 }
 0x23d   : > { %v1858_v35 = vadd.f32 %v1857_v39, %v5148_v31 }
 0x23f   : > { %v3500_v52 = vpop.f32.mrf.mxu0 }
 0x240   : > { %v2815_v13 = vadd.f32 %v3500_v52, %v1863_v23 }
 0x241   : > { %v2695_v38 = vpop.f32.mrf.mxu0 }
 0x242   : > { %2847 = vst.msk [vmem:[%s5186_s8 + $0x58] sm:$0xff] %vm214_vm0, %v2815_v13  ;;  %v2814_v11 = vadd.f32 %v2695_v38, %v1858_v35  ;;  %v2948_v30 = vmul.f32 %v2815_v13, %v2815_v13  ;;  %v2889_v19 = vsel %vm214_vm0, %v2815_v13, 0.0 }
 0x244   : > { %2846 = vst.msk [vmem:[%s5186_s8 + $0x50] sm:$0xff] %vm214_vm0, %v2814_v11  ;;  %v2887_v42 = vsel %vm214_vm0, %v2814_v11, 0.0  ;;  %v2947_v6 = vmul.f32 %v2814_v11, %v2814_v11  ;;  %v2990_v16 = vsel %vm214_vm0, %v2948_v30, 0.0 }
 0x245   : > { %v2888_v57 = vadd.f32 %v2887_v42, %v2886_v48 }
 0x246   : > { %v2988_v0 = vsel %vm214_vm0, %v2947_v6, 0.0 }
 0x247   : > { %v2989_v54 = vadd.f32 %v2988_v0, %v2987_v46  ;;  %v2890_v31 = vadd.f32 %v2889_v19, %v2888_v57 }
 0x249   : > { %v2991_v49 = vadd.f32 %v2990_v16, %v2989_v54 }
 0x24a   : > { %v3449_v58 = vpop.f32.mrf.mxu1 }
 0x24b   : > { %v1873_v51 = vadd.f32 %v3449_v58, %v5154_v7 }
 0x24c   : > { %v1867_v18 = vpop.f32.mrf.mxu1 }
 0x24d   : > { %v1868_v27 = vadd.f32 %v1867_v18, %v5162_v63 }
 0x24f   : > { %v3503_v21 = vpop.f32.mrf.mxu0 }
 0x250   : > { %v2817_v32 = vadd.f32 %v3503_v21, %v1873_v51 }
 0x251   : > { %v2705_v14 = vpop.f32.mrf.mxu0 }
 0x252   : > { %2849 = vst.msk [vmem:[%s5186_s8 + $0x68] sm:$0xff] %vm214_vm0, %v2817_v32  ;;  %v2816_v15 = vadd.f32 %v2705_v14, %v1868_v27  ;;  %v2950_v53 = vmul.f32 %v2817_v32, %v2817_v32  ;;  %v2893_v43 = vsel %vm214_vm0, %v2817_v32, 0.0 }
 0x254   : > { %2848 = vst.msk [vmem:[%s5186_s8 + $0x60] sm:$0xff] %vm214_vm0, %v2816_v15  ;;  %v2891_v59 = vsel %vm214_vm0, %v2816_v15, 0.0  ;;  %v2949_v47 = vmul.f32 %v2816_v15, %v2816_v15  ;;  %v2994_v5 = vsel %vm214_vm0, %v2950_v53, 0.0 }
 0x255   : > { %v2892_v3 = vadd.f32 %v2891_v59, %v2890_v31 }
 0x256   : > { %v2992_v7 = vsel %vm214_vm0, %v2949_v47, 0.0 }
 0x257   : > { %v2993_v26 = vadd.f32 %v2992_v7, %v2991_v49  ;;  %v2894_v63 = vadd.f32 %v2893_v43, %v2892_v3 }
 0x259   : > { %v2995_v1 = vadd.f32 %v2994_v5, %v2993_v26 }
 0x25a   : > { %v3452_v17 = vpop.f32.mrf.mxu1 }
 0x25b   : > { %v1883_v2 = vadd.f32 %v3452_v17, %v5168_v28 }
 0x25c   : > { %v1877_v22 = vpop.f32.mrf.mxu1 }
 0x25d   : > { %v1878_v29 = vadd.f32 %v1877_v22, %v5172_v12 }
 0x25f   : > { %v3506_v41 = vpop.f32.mrf.mxu0 }
 0x260   : > { %v2819_v40 = vadd.f32 %v3506_v41, %v1883_v2 }
 0x261   : > { %v2715_v55 = vpop.f32.mrf.mxu0 }
 0x262   : > { %2851 = vst.msk [vmem:[%s5186_s8 + $0x78] sm:$0xff] %vm214_vm0, %v2819_v40  ;;  %v2818_v48 = vadd.f32 %v2715_v55, %v1878_v29  ;;  %v2952_v37 = vmul.f32 %v2819_v40, %v2819_v40  ;;  %v2897_v23 = vsel %vm214_vm0, %v2819_v40, 0.0 }
 0x264   : > { %2850 = vst.msk [vmem:[%s5186_s8 + $0x70] sm:$0xff] %vm214_vm0, %v2818_v48  ;;  %v2895_v25 = vsel %vm214_vm0, %v2818_v48, 0.0  ;;  %v2951_v46 = vmul.f32 %v2818_v48, %v2818_v48  ;;  %v2998_v35 = vsel %vm214_vm0, %v2952_v37, 0.0 }
 0x265   : > { %v2896_v39 = vadd.f32 %v2895_v25, %v2894_v63 }
 0x266   : > { %v2996_v28 = vsel %vm214_vm0, %v2951_v46, 0.0 }
 0x267   : > { %v2997_v52 = vadd.f32 %v2996_v28, %v2995_v1  ;;  %v2898_v12 = vadd.f32 %v2897_v23, %v2896_v39 }
 0x269   : > { %v2999_v38 = vadd.f32 %v2998_v35, %v2997_v52 }
 0x26a   : > { %v3455_v13 = vpop.f32.mrf.mxu1 }
 0x26b   : > { %v1893_v30 = vadd.f32 %v3455_v13, %v5061_v4 }
 0x26c   : > { %v1887_v11 = vpop.f32.mrf.mxu1 }
 0x26d   : > { %v1888_v6 = vadd.f32 %v1887_v11, %v5064_v45 }
 0x26f   : > { %v3509_v42 = vpop.f32.mrf.mxu0 }
 0x270   : > { %v2821_v57 = vadd.f32 %v3509_v42, %v1893_v30 }
 0x271   : > { %v2725_v19 = vpop.f32.mrf.mxu0 }
 0x272   : > { %2853 = vst.msk [vmem:[%s5186_s8 + $0x88] sm:$0xff] %vm214_vm0, %v2821_v57  ;;  %v2820_v0 = vadd.f32 %v2725_v19, %v1888_v6  ;;  %v2954_v54 = vmul.f32 %v2821_v57, %v2821_v57  ;;  %v2901_v49 = vsel %vm214_vm0, %v2821_v57, 0.0 }
 0x274   : > { %2852 = vst.msk [vmem:[%s5186_s8 + $0x80] sm:$0xff] %vm214_vm0, %v2820_v0  ;;  %v2899_v31 = vsel %vm214_vm0, %v2820_v0, 0.0  ;;  %v2953_v16 = vmul.f32 %v2820_v0, %v2820_v0  ;;  %v3002_v51 = vsel %vm214_vm0, %v2954_v54, 0.0 }
 0x275   : > { %v2900_v58 = vadd.f32 %v2899_v31, %v2898_v12 }
 0x276   : > { %v3000_v4 = vsel %vm214_vm0, %v2953_v16, 0.0 }
 0x277   : > { %v3001_v18 = vadd.f32 %v3000_v4, %v2999_v38  ;;  %v2902_v45 = vadd.f32 %v2901_v49, %v2900_v58 }
 0x279   : > { %v3003_v27 = vadd.f32 %v3002_v51, %v3001_v18 }
 0x27a   : > { %v3458_v21 = vpop.f32.mrf.mxu1 }
 0x27b   : > { %v1903_v14 = vadd.f32 %v3458_v21, %v5073_v24 }
 0x27c   : > { %v1897_v32 = vpop.f32.mrf.mxu1 }
 0x27d   : > { %v1898_v53 = vadd.f32 %v1897_v32, %v5082_v10 }
 0x27f   : > { %v3512_v15 = vpop.f32.mrf.mxu0 }
 0x280   : > { %v2823_v59 = vadd.f32 %v3512_v15, %v1903_v14 }
 0x281   : > { %v2735_v47 = vpop.f32.mrf.mxu0 }
 0x282   : > { %2855 = vst.msk [vmem:[%s5186_s8 + $0x98] sm:$0xff] %vm214_vm0, %v2823_v59  ;;  %v2822_v3 = vadd.f32 %v2735_v47, %v1898_v53  ;;  %v2956_v43 = vmul.f32 %v2823_v59, %v2823_v59  ;;  %v2905_v5 = vsel %vm214_vm0, %v2823_v59, 0.0 }
 0x284   : > { %2854 = vst.msk [vmem:[%s5186_s8 + $0x90] sm:$0xff] %vm214_vm0, %v2822_v3  ;;  %v2903_v7 = vsel %vm214_vm0, %v2822_v3, 0.0  ;;  %v2955_v26 = vmul.f32 %v2822_v3, %v2822_v3  ;;  %v3006_v1 = vsel %vm214_vm0, %v2956_v43, 0.0 }
 0x285   : > { %v2904_v63 = vadd.f32 %v2903_v7, %v2902_v45 }
 0x286   : > { %v3004_v24 = vsel %vm214_vm0, %v2955_v26, 0.0 }
 0x287   : > { %v3005_v17 = vadd.f32 %v3004_v24, %v3003_v27  ;;  %v2906_v10 = vadd.f32 %v2905_v5, %v2904_v63 }
 0x289   : > { %v3007_v2 = vadd.f32 %v3006_v1, %v3005_v17 }
 0x28a   : > { %v3461_v22 = vpop.f32.mrf.mxu1 }
 0x28b   : > { %v1913_v29 = vadd.f32 %v3461_v22, %v5087_v34 }
 0x28c   : > { %v1907_v41 = vpop.f32.mrf.mxu1 }
 0x28d   : > { %v1908_v55 = vadd.f32 %v1907_v41, %v5095_v61 }
 0x28f   : > { %v3515_v40 = vpop.f32.mrf.mxu0 }
 0x290   : > { %v2825_v48 = vadd.f32 %v3515_v40, %v1913_v29 }
 0x291   : > { %v2745_v37 = vpop.f32.mrf.mxu0 }
 0x292   : > { %2857 = vst.msk [vmem:[%s5186_s8 + $0xa8] sm:$0xff] %vm214_vm0, %v2825_v48  ;;  %v2824_v25 = vadd.f32 %v2745_v37, %v1908_v55  ;;  %v2958_v46 = vmul.f32 %v2825_v48, %v2825_v48  ;;  %v2909_v52 = vsel %vm214_vm0, %v2825_v48, 0.0 }
 0x294   : > { %2856 = vst.msk [vmem:[%s5186_s8 + $0xa0] sm:$0xff] %vm214_vm0, %v2824_v25  ;;  %v2907_v39 = vsel %vm214_vm0, %v2824_v25, 0.0  ;;  %v2957_v23 = vmul.f32 %v2824_v25, %v2824_v25  ;;  %v3010_v35 = vsel %vm214_vm0, %v2958_v46, 0.0 }
 0x295   : > { %v2908_v28 = vadd.f32 %v2907_v39, %v2906_v10 }
 0x296   : > { %v3008_v34 = vsel %vm214_vm0, %v2957_v23, 0.0 }
 0x297   : > { %v3009_v12 = vadd.f32 %v3008_v34, %v3007_v2  ;;  %v2910_v61 = vadd.f32 %v2909_v52, %v2908_v28 }
 0x299   : > { %v3011_v38 = vadd.f32 %v3010_v35, %v3009_v12 }
 0x29a   : > { %v3464_v13 = vpop.f32.mrf.mxu1 }
 0x29b   : > { %v1923_v30 = vadd.f32 %v3464_v13, %v5100_v9 }
 0x29c   : > { %v1917_v11 = vpop.f32.mrf.mxu1 }
 0x29d   : > { %v1918_v6 = vadd.f32 %v1917_v11, %v5109_v20 }
 0x29f   : > { %v3518_v42 = vpop.f32.mrf.mxu0 }
 0x2a0   : > { %v2827_v57 = vadd.f32 %v3518_v42, %v1923_v30 }
 0x2a1   : > { %v2755_v19 = vpop.f32.mrf.mxu0 }
 0x2a2   : > { %2859 = vst.msk [vmem:[%s5186_s8 + $0xb8] sm:$0xff] %vm214_vm0, %v2827_v57  ;;  %v2826_v0 = vadd.f32 %v2755_v19, %v1918_v6  ;;  %v2960_v43 = vmul.f32 %v2827_v57, %v2827_v57  ;;  %v2913_v17 = vsel %vm214_vm0, %v2827_v57, 0.0 }
 0x2a4   : > { %2858 = vst.msk [vmem:[%s5186_s8 + $0xb0] sm:$0xff] %vm214_vm0, %v2826_v0  ;;  %v2959_v15 = vmul.f32 %v2826_v0, %v2826_v0  ;;  %v2911_v53 = vsel %vm214_vm0, %v2826_v0, 0.0 }
 0x2a5   : > { %v2912_v3 = vadd.f32 %v2911_v53, %v2910_v61 }
 0x2a6   : > { %v3012_v47 = vsel %vm214_vm0, %v2959_v15, 0.0 }
 0x2a7   : > { %v3013_v5 = vadd.f32 %v3012_v47, %v3011_v38  ;;  %v2914_v22 = vadd.f32 %v2913_v17, %v2912_v3 }
 0x2aa   : > { %v3467_v54 = vpop.f32.mrf.mxu1 }
 0x2ab   : > { %v1933_v16 = vadd.f32 %v3467_v54, %v5115_v36 }
 0x2ac   : > { %v1927_v31 = vpop.f32.mrf.mxu1 }
 0x2ad   : > { %v1928_v9 = vadd.f32 %v1927_v31, %v5123_v62 }
 0x2af   : > { %v3521_v58 = vpop.f32.mrf.mxu0 }
 0x2b0   : > { %v2829_v49 = vadd.f32 %v3521_v58, %v1933_v16 }
 0x2b1   : > { %v2765_v4 = vpop.f32.mrf.mxu0 }
 0x2b2   : > { %2861 = vst.msk [vmem:[%s5186_s8 + $0xc8] sm:$0xff] %vm214_vm0, %v2829_v49  ;;  %v2828_v20 = vadd.f32 %v2765_v4, %v1928_v9  ;;  %v2917_v48 = vsel %vm214_vm0, %v2829_v49, 0.0 }
 0x2b4   : > { %2860 = vst.msk [vmem:[%s5186_s8 + $0xc0] sm:$0xff] %vm214_vm0, %v2828_v20  ;;  %v2961_v7 = vmul.f32 %v2828_v20, %v2828_v20  ;;  %v2915_v10 = vsel %vm214_vm0, %v2828_v20, 0.0 }
 0x2b5   : > { %v2916_v41 = vadd.f32 %v2915_v10, %v2914_v22 }
 0x2b6   : > { %v3016_v2 = vsel %vm214_vm0, %v2961_v7, 0.0 }
 0x2b7   : > { %v2918_v25 = vadd.f32 %v2917_v48, %v2916_v41 }
 0x2ba   : > { %v3470_v18 = vpop.f32.mrf.mxu1 }
 0x2bb   : > { %v1943_v51 = vadd.f32 %v3470_v18, %v5130_v44 }
 0x2bc   : > { %v1937_v45 = vpop.f32.mrf.mxu1 }
 0x2bd   : > { %v1938_v27 = vadd.f32 %v1937_v45, %v5136_v56 }
 0x2bf   : > { %v3524_v21 = vpop.f32.mrf.mxu0 }
 0x2c0   : > { %v2831_v32 = vadd.f32 %v3524_v21, %v1943_v51 }
 0x2c1   : > { %v2775_v36 = vpop.f32.mrf.mxu0 }
 0x2c2   : > { %2863 = vst.msk [vmem:[%s5186_s8 + $0xd8] sm:$0xff] %vm214_vm0, %v2831_v32  ;;  %v2830_v14 = vadd.f32 %v2775_v36, %v1938_v27  ;;  %v2964_v34 = vmul.f32 %v2831_v32, %v2831_v32  ;;  %v2921_v35 = vsel %vm214_vm0, %v2831_v32, 0.0 }
 0x2c4   : > { %2862 = vst.msk [vmem:[%s5186_s8 + $0xd0] sm:$0xff] %vm214_vm0, %v2830_v14  ;;  %v2963_v40 = vmul.f32 %v2830_v14, %v2830_v14  ;;  %v2919_v37 = vsel %vm214_vm0, %v2830_v14, 0.0  ;;  %v3022_v30 = vsel %vm214_vm0, %v2964_v34, 0.0 }
 0x2c5   : > { %v2920_v23 = vadd.f32 %v2919_v37, %v2918_v25 }
 0x2c6   : > { %v3020_v39 = vsel %vm214_vm0, %v2963_v40, 0.0 }
 0x2c7   : > { %v2922_v38 = vadd.f32 %v2921_v35, %v2920_v23 }
 0x2ca   : > { %v3473_v62 = vpop.f32.mrf.mxu1 }
 0x2cb   : > { %v1953_v44 = vadd.f32 %v3473_v62, %v5140_v50  ;;  %v3014_v50 = vsel %vm214_vm0, %v2960_v43, 0.0 }
 0x2cc   : > { %v1947_v59 = vpop.f32.mrf.mxu1  ;;  %v3015_v29 = vadd.f32 %v3014_v50, %v3013_v5 }
 0x2cd   : > { %v1948_v26 = vadd.f32 %v1947_v59, %v5151_v60  ;;  %v2962_v60 = vmul.f32 %v2829_v49, %v2829_v49 }
 0x2ce   : > { %v3017_v55 = vadd.f32 %v3016_v2, %v3015_v29 }
 0x2cf   : > { %v3527_v56 = vpop.f32.mrf.mxu0  ;;  %v3018_v46 = vsel %vm214_vm0, %v2962_v60, 0.0 }
 0x2d0   : > { %v2833_v63 = vadd.f32 %v3527_v56, %v1953_v44  ;;  %v3019_v28 = vadd.f32 %v3018_v46, %v3017_v55 }
 0x2d1   : > { %v2785_v24 = vpop.f32.mrf.mxu0 }
 0x2d2   : > { %2865 = vst.msk [vmem:[%s5186_s8 + $0xe8] sm:$0xff] %vm214_vm0, %v2833_v63  ;;  %v2832_v1 = vadd.f32 %v2785_v24, %v1948_v26  ;;  %v3021_v61 = vadd.f32 %v3020_v39, %v3019_v28  ;;  %v2966_v54 = vmul.f32 %v2833_v63, %v2833_v63  ;;  %v2925_v49 = vsel %vm214_vm0, %v2833_v63, 0.0 }
 0x2d4   : > { %2864 = vst.msk [vmem:[%s5186_s8 + $0xe0] sm:$0xff] %vm214_vm0, %v2832_v1  ;;  %v2965_v12 = vmul.f32 %v2832_v1, %v2832_v1  ;;  %v2923_v13 = vsel %vm214_vm0, %v2832_v1, 0.0  ;;  %v3023_v19 = vadd.f32 %v3022_v30, %v3021_v61  ;;  %v3026_v18 = vsel %vm214_vm0, %v2966_v54, 0.0 }
 0x2d5   : > { %v2924_v57 = vadd.f32 %v2923_v13, %v2922_v38 }
 0x2d6   : > { %v3024_v42 = vsel %vm214_vm0, %v2965_v12, 0.0 }
 0x2d7   : > { %v3025_v58 = vadd.f32 %v3024_v42, %v3023_v19  ;;  %v2926_v20 = vadd.f32 %v2925_v49, %v2924_v57 }
 0x2da   : > { %v3476_v52 = vpop.f32.mrf.mxu1 }
 0x2db   : > { %v1963_v6 = vadd.f32 %v3476_v52, %v5158_v8 }
 0x2dc   : > { %v1957_v11 = vpop.f32.mrf.mxu1 }
 0x2dd   : > { %v1958_v31 = vadd.f32 %v1957_v11, %v5166_v33  ;;  %v3027_v33 = vadd.f32 %v3026_v18, %v3025_v58 }
 0x2e2   : > { %v3530_v0 = vpop.f32.mrf.mxu0 }
 0x2e3   : > { %v2835_v16 = vadd.f32 %v3530_v0, %v1963_v6 }
 0x2e4   : > { %v2795_v9 = vpop.f32.mrf.mxu0 }
 0x2e5   : > { %2867 = vst.msk [vmem:[%s5186_s8 + $0xf8] sm:$0xff] %vm214_vm0, %v2835_v16  ;;  %v2834_v4 = vadd.f32 %v2795_v9, %v1958_v31  ;;  %v2968_v45 = vmul.f32 %v2835_v16, %v2835_v16  ;;  %v2929_v27 = vsel %vm214_vm0, %v2835_v16, 0.0 }
 0x2e7   : > { %2866 = vst.msk [vmem:[%s5186_s8 + $0xf0] sm:$0xff] %vm214_vm0, %v2834_v4  ;;  %v2927_v8 = vsel %vm214_vm0, %v2834_v4, 0.0  ;;  %v2967_v51 = vmul.f32 %v2834_v4, %v2834_v4  ;;  %v3030_v62 = vsel %vm214_vm0, %v2968_v45, 0.0 }
 0x2e8   : > { %v2928_v21 = vadd.f32 %v2927_v8, %v2926_v20 }
 0x2e9   : > { %v3028_v32 = vsel %vm214_vm0, %v2967_v51, 0.0 }
 0x2ea   : > { %v2930_v36 = vadd.f32 %v2929_v27, %v2928_v21  ;;  %v3029_v14 = vadd.f32 %v3028_v32, %v3027_v33 }
 0x2ec   : > { %v2931_v15 = vrot.slane %v2930_v36, 4  ;;  %v3031_v53 = vadd.f32 %v3030_v62, %v3029_v14 }
 0x2ee   : > { %v2932_v59 = vadd.f32 %v2931_v15, %v2930_v36  ;;  %v3032_v47 = vrot.slane %v3031_v53, 4 }
 0x2f0   : > { %v2933_v44 = vrot.slane %v2932_v59, 2  ;;  %v3033_v3 = vadd.f32 %v3032_v47, %v3031_v53 }
 0x2f2   : > { %v2934_v56 = vadd.f32 %v2933_v44, %v2932_v59  ;;  %v3034_v43 = vrot.slane %v3033_v3, 2 }
 0x2f4   : > { %v2935_v7 = vrot.slane %v2934_v56, 1  ;;  %v3035_v26 = vadd.f32 %v3034_v43, %v3033_v3 }
 0x2f6   : > { %v3036_v63 = vrot.slane %v3035_v26, 1  ;;  %v2936_v5 = vadd.f32 %v2935_v7, %v2934_v56 }
 0x2f8   : > { %v3037_v24 = vadd.f32 %v3036_v63, %v3035_v26 }
 0x2fa   : > { %v3039_v17 = vsel %vm3038_vm7, %v2936_v5, %v3037_v24 }
 0x2fb   : > { %3040 = vst.msk [vmem:[%s171_s10] sm:$0x3] %vm217_vm1, %v3039_v17 }
 0x2fc   : > { %3610 = shalt.err (!%p3607_p3)
}
 0x2fd   : > { %s3611_s5 = scalar_lea.hbm %s5390_s20, 32  ;;  %s3615_s29 = scalar_lea.hbm %s5429_s3, 64 }
 0x2fe   : > { %p3612_p4 = scmp.ne.s32.totalorder %s5390_s20, %s3611_s5  ;;  %p3616_p9 = scmp.lt.s32.totalorder %s5390_s20, %s5429_s3 }
 0x2ff   : > { %p3617_p10 = scmp.lt.s32.totalorder %s3615_s29, %s3611_s5 }
 0x300   : > { %p3613_p7 = pnand %p3612_p4, %p3721_p5 }
 0x301   : > { %p3618_p11 = por %p3617_p10, %p3616_p9 }
 0x302   : > { %p3614_p8 = pneg %p3613_p7 }
 0x304   : > { %p3619_p12 = pnand %p3618_p11, %p3614_p8 }
 0x306   : > { %3622 = shalt.err (!%p3619_p12)
}
 0x307   : > { %3537 = dma.vmem_to_hbm [thread:$0]  (%p3721_p5), %s3064_s11, 32, %s5390_s20, %s3047_s26  }
 0x308 PF: > { %p3543_p13 = scmp.ge.s32.totalorder %s3657_s15, 2  ;;  %s3083_s24 = sand.u32 1, %s3645_s12  }
 0x309   : > { %s3084_s25 = scalar_lea.sflag [#allocation4], %s3083_s24 }
 0x30a   : > { %p3540_p0 = pnand %p3543_p13, %p3725_p6 }
 0x30c   : > { %p3541_p1 = pneg %p3540_p0 }
 0x30e   : > { %3640 = dma.done.wait (%p3541_p1), %s3084_s25, 32  }
 0x30f   : > { %3642 = vsyncadd (%p3541_p1), %s3084_s25, 4294967264  ;;  %p14_p2 = scmp.ge.s32.totalorder %s3708_s18, 4   ;;  %s5487_s12 = smov %s3649_s13 }
 0x310   : > { %s5488_s13 = smov %s3653_s14  ;;  %s5489_s14 = smov %s3719_s21 }
 0x311   : > { %s5490_s15 = smov %s3708_s18  ;;  %16 = sbr.rel (!%p14_p2) target bundleno = 3 (0x3), region = 80 }
 0x316   :  { %3089 = vsyncpa [#allocation4], 1 }
 0x317   :  { %3091 = vsyncpa [#allocation4 + $0x1], 1 }

</bundles_post_ra>
